<compile_context>
chip_gen: v5e
topology: v5e:2x2
jax: 0.10.0
libtpu: 0.0.40
codegen_flags: <defaults>
</compile_context>

<pallas_src>
import functools

import numpy as np
import jax
import jax.numpy as jnp
from jax import lax
from jax.experimental import pallas as pl
from jax.experimental.pallas import tpu as pltpu


# ---------------------------------------------------------------------------
# Pallas kernel: the full sequence recurrence in one invocation.
# ---------------------------------------------------------------------------
def _convlstm_kernel(
    xcol_ref,   # (KKCI, seq*HW)    bf16  im2col'ed input frames, time on lanes
    h0col_ref,  # (KKCH, HW)        bf16  im2col'ed initial hidden state
    mask_ref,   # (KKCH, HW)        bf16  per-tap validity mask (kills roll wrap)
    wx_ref,     # (4*CH, KKCI)      bf16  gate weights acting on x
    whp_ref,    # (4*CH+8, KKCH)    bf16  gate weights on h; row 4*CH = pool conv
    bc_ref,     # (4*CH, 1)         f32   gate bias
    w1_ref,     # (HW, NHP)         bf16  fc1 weights embedded over pooled lanes
    b1_ref,     # (1, NHP)          f32   fc1 bias (+ folded pool-conv bias)
    w2_ref,     # (NHP, 4)          bf16  fc2 weights
    b2_ref,     # (1, 4)            f32
    out_ref,    # (seq, 4)          f32   hidden_bb
    gx_ref,     # scratch VMEM (4*CH, seq*HW) f32  precomputed x gates (+bias)
    hcol_ref,   # scratch VMEM (KKCH, HW)     bf16 carried im2col'ed hidden state
    pconv_ref,  # scratch VMEM (seq, HW)      f32  pool-conv rows, one per step
    *, seq, H, W, K, pad, CH, pool,
):
    HW = H * W
    G = 4 * CH
    f32 = jnp.float32
    bf16 = jnp.bfloat16

    def gather(a, s):
        # result[..., j] = a[..., j + s]  (lane rotation; wrap handled by masks
        # for the conv taps and by zero-weighted fc1 lanes for the pool).
        if s % HW == 0:
            return a
        return pltpu.roll(a, shift=(-s) % HW, axis=1)

    def sig(x):
        # sigmoid via tanh: single EUP push instead of exp + reciprocal.
        return 0.5 * jnp.tanh(0.5 * x) + 0.5

    def build_hcol(h):
        # h: (CH, HW) f32  ->  im2col'ed (K*K*CH, HW) bf16 matmul operand.
        parts = []
        for dy in range(K):
            for dx in range(K):
                parts.append(gather(h, (dy - pad) * W + (dx - pad)))
        # mask is bf16 and applied AFTER the bf16 cast (halves VALU traffic).
        return jnp.concatenate(parts, axis=0).astype(bf16) * mask_ref[...]

    # Loop-invariant x-part of the gate conv (+ bias) for ALL steps: one
    # lane-dense N = seq*HW matmul instead of seq small ones on the critical
    # path; also removes the per-step bias broadcast.
    gx_ref[...] = (jnp.dot(wx_ref[...], xcol_ref[...], preferred_element_type=f32)
                   + bc_ref[...])

    # Carried im2col'ed hidden state lives in VMEM scratch (not as live vregs).
    hcol_ref[...] = h0col_ref[...]
    whp = whp_ref[...]                      # small (3 vregs), reused every step

    c = jnp.zeros((CH, HW), f32)
    for t in range(seq):                    # seq is small -> fully unrolled
        # One recurrent matmul per step; row G is the pool conv of step t-1.
        gh = jnp.dot(whp, hcol_ref[...], preferred_element_type=f32)  # (G+8, HW)
        if t >= 1:
            pconv_ref[t - 1:t, :] = gh[G:G + 1, :]

        gates = gh[:G, :] + gx_ref[:, t * HW:(t + 1) * HW]            # (G, HW)
        ft = sig(gates[0 * CH:1 * CH])
        it = sig(gates[1 * CH:2 * CH])
        gt = jnp.tanh(gates[2 * CH:3 * CH])
        ot = sig(gates[3 * CH:4 * CH])

        c = ft * c + it * gt                                           # (CH, HW)
        h = ot * jnp.tanh(c)

        # Rebuilt once; shared by next step's gate conv and its pool conv.
        hcol_ref[...] = build_hcol(h)

    # Pool conv of the final step needs one extra (cheap) matmul.
    gh_last = jnp.dot(whp, hcol_ref[...], preferred_element_type=f32)
    pconv_ref[seq - 1:seq, :] = gh_last[G:G + 1, :]

    # -------- bb head, batched over all steps (off the serial chain) --------
    # pool x pool max-pool as a log-tree of lane rolls, all rows at once.
    m = pconv_ref[...]                                                  # (seq, HW)
    s = 1
    while s < pool:
        m = jnp.maximum(m, gather(m, s))
        s *= 2
    s = W
    while s < pool * W:
        m = jnp.maximum(m, gather(m, s))
        s *= 2

    # fc1 folded over the full HW lanes (zero weight off pooled positions),
    # then fc2; both batched with M = seq.
    bb = jnp.dot(m.astype(bf16), w1_ref[...], preferred_element_type=f32) + b1_ref[...]
    bb = jnp.dot(bb.astype(bf16), w2_ref[...], preferred_element_type=f32) + b2_ref[...]
    out_ref[...] = bb                                                    # (seq, 4)


# ---------------------------------------------------------------------------
# Wrapper: PyTorch-style NCHW glue, im2col / weight re-layout + pallas_call
# ---------------------------------------------------------------------------
def conv_lstm_forward(xs_nchw, h0_nchw, params, *, filter_size=3, pool=4):
    seq, batch, cin, H, W = xs_nchw.shape
    assert batch == 1, "the module's recurrence implicitly assumes batch=1"
    assert pool & (pool - 1) == 0, "log-tree max-pool assumes pool is a power of 2"
    assert H % pool == 0 and W % pool == 0, "pool must divide the spatial dims"
    K = filter_size
    p = (K - 1) // 2
    chid = h0_nchw.shape[1]
    HW = H * W
    Hq, Wq = H // pool, W // pool
    CH = max(8, -(-chid // 8) * 8)              # hidden channels -> sublane tile
    KKCI = -(-(K * K * cin) // 8) * 8           # x im2col rows, padded
    KKCH = K * K * CH                           # h im2col rows
    NH = params["fc1_w"].shape[0]
    NHP = -(-NH // 128) * 128                   # fc hidden -> full lane tile
    assert params["fc1_w"].shape[1] == Hq * Wq
    f32, bf16 = jnp.float32, jnp.bfloat16

    # ---- im2col of input frames, relaid to (KKCI, seq*HW) --------------------
    x = xs_nchw[:, 0].astype(f32)               # (seq, cin, H, W)
    xp = jnp.pad(x, ((0, 0), (0, 0), (p, p), (p, p)))
    xcols = [xp[:, :, dy:dy + H, dx:dx + W].reshape(seq, cin, HW)
             for dy in range(K) for dx in range(K)]
    xcol = jnp.concatenate(xcols, axis=1)                              # (seq, KKci, HW)
    xcol = jnp.pad(xcol, ((0, 0), (0, KKCI - K * K * cin), (0, 0)))
    xcol = jnp.transpose(xcol, (1, 0, 2)).reshape(KKCI, seq * HW).astype(bf16)

    # ---- im2col of the initial hidden state: (KKCH, HW) ----------------------
    h0 = jnp.pad(h0_nchw[0].astype(f32), ((0, CH - chid), (0, 0), (0, 0)))
    h0p = jnp.pad(h0, ((0, 0), (p, p), (p, p)))
    hcols = [h0p[:, dy:dy + H, dx:dx + W].reshape(CH, HW)
             for dy in range(K) for dx in range(K)]
    h0col = jnp.concatenate(hcols, axis=0).astype(bf16)

    # ---- per-tap validity masks (bf16; 0/1 so exact) --------------------------
    yy, xx = np.mgrid[0:H, 0:W]
    mask_np = np.zeros((K * K, HW), np.float32)
    for dy in range(K):
        for dx in range(K):
            oy, ox = dy - p, dx - p
            ok = (yy + oy >= 0) & (yy + oy < H) & (xx + ox >= 0) & (xx + ox < W)
            mask_np[dy * K + dx] = ok.reshape(HW).astype(np.float32)
    mask_full = jnp.asarray(
        np.repeat(mask_np[:, None, :], CH, axis=1).reshape(KKCH, HW)).astype(bf16)

    # ---- gate-conv weights: channel-padded, tap-flattened, gate-aligned ------
    conv_w = params["conv_w"].astype(f32)       # (4*chid, cin+chid, K, K)
    wx_s = jnp.transpose(conv_w[:, :cin], (0, 2, 3, 1)).reshape(4 * chid, K * K * cin)
    wx_s = jnp.pad(wx_s, ((0, 0), (0, KKCI - K * K * cin)))
    wh_s = jnp.pad(jnp.transpose(conv_w[:, cin:], (0, 2, 3, 1)),
                   ((0, 0), (0, 0), (0, 0), (0, CH - chid))).reshape(4 * chid, KKCH)

    def pad_gate_rows(w_s):
        w = jnp.zeros((4 * CH, w_s.shape[1]), f32)
        for g in range(4):
            w = w.at[g * CH:g * CH + chid].set(w_s[g * chid:(g + 1) * chid])
        return w

    wx = pad_gate_rows(wx_s).astype(bf16)
    wh = pad_gate_rows(wh_s)
    # pool-conv weights folded as an extra 8-row slab (row 0 = wp) into wh
    wp_row = jnp.pad(jnp.transpose(params["pool_w"].astype(f32), (0, 2, 3, 1)),
                     ((0, 0), (0, 0), (0, 0), (0, CH - chid))).reshape(1, KKCH)
    whp = jnp.concatenate([wh, wp_row, jnp.zeros((7, KKCH), f32)], axis=0).astype(bf16)

    bc = jnp.zeros((4 * CH, 1), f32)
    for g in range(4):
        bc = bc.at[g * CH:g * CH + chid, 0].set(
            params["conv_b"][g * chid:(g + 1) * chid])

    # ---- fc1 embedded over the pooled lanes; pool-conv bias folded into b1 ----
    js = np.asarray([(pool * qy) * W + pool * qx
                     for qy in range(Hq) for qx in range(Wq)], np.int32)
    w1 = jnp.zeros((HW, NHP), f32).at[js, :NH].set(params["fc1_w"].T).astype(bf16)
    b1_eff = params["fc1_b"] + params["pool_b"][0] * jnp.sum(params["fc1_w"], axis=1)
    b1 = jnp.pad(b1_eff, (0, NHP - NH)).reshape(1, NHP).astype(f32)
    w2 = jnp.pad(params["fc2_w"].T, ((0, NHP - NH), (0, 0))).astype(bf16)
    b2 = params["fc2_b"].reshape(1, 4).astype(f32)

    kernel = functools.partial(_convlstm_kernel, seq=seq, H=H, W=W, K=K, pad=p,
                               CH=CH, pool=pool)

    # Single gridless invocation: frames, weights and state stay VMEM resident.
    out = pl.pallas_call(
        kernel,
        out_shape=jax.ShapeDtypeStruct((seq, 4), jnp.float32),
        scratch_shapes=[
            pltpu.VMEM((4 * CH, seq * HW), jnp.float32),   # gx (x gates + bias)
            pltpu.VMEM((KKCH, HW), jnp.bfloat16),          # carried hcol
            pltpu.VMEM((seq, HW), jnp.float32),            # pconv rows
        ],
    )(xcol, h0col, mask_full, wx, whp, bc, w1, b1, w2, b2)
    return out                                   # (seq, 4), same as hidden_bb


# ---------------------------------------------------------------------------
# Pure-JAX reference (PyTorch semantics; matmul/conv operands in bf16 with f32
# accumulation to match the kernel's single-pass MXU precision).
# ---------------------------------------------------------------------------
def ref_forward(xs_nchw, h0_nchw, params, *, filter_size=3, pool=4):
    seq = xs_nchw.shape[0]
    K = filter_size
    p = (K - 1) // 2
    dn = ("NCHW", "OIHW", "NCHW")
    bf16, f32 = jnp.bfloat16, jnp.float32
    conv_w = params["conv_w"].astype(bf16)
    pool_w = params["pool_w"].astype(bf16)
    w1 = params["fc1_w"].T.astype(bf16)
    w2 = params["fc2_w"].T.astype(bf16)
    h = h0_nchw.astype(f32)
    c = jnp.zeros_like(h)
    outs = []
    for t in range(seq):
        combined = jnp.concatenate([xs_nchw[t], h], axis=1).astype(bf16)
        conv = lax.conv_general_dilated(
            combined, conv_w, (1, 1), [(p, p), (p, p)],
            dimension_numbers=dn, preferred_element_type=f32,
        ) + params["conv_b"][None, :, None, None]
        ft, it, gt, ot = jnp.split(conv, 4, axis=1)
        ft = jax.nn.sigmoid(ft)
        it = jax.nn.sigmoid(it)
        gt = jnp.tanh(gt)
        ot = jax.nn.sigmoid(ot)
        c = ft * c + it * gt
        h = ot * jnp.tanh(c)
        pc = lax.conv_general_dilated(
            h.astype(bf16), pool_w, (1, 1), [(p, p), (p, p)],
            dimension_numbers=dn, preferred_element_type=f32,
        ) + params["pool_b"][None, :, None, None]
        pooled = lax.reduce_window(pc, -jnp.inf, lax.max,
                                   (1, 1, pool, pool), (1, 1, pool, pool), "VALID")
        flat = pooled.reshape(1, -1)
        bb = jnp.dot(flat.astype(bf16), w1, preferred_element_type=f32) + params["fc1_b"]
        bb = jnp.dot(bb.astype(bf16), w2, preferred_element_type=f32) + params["fc2_b"]
        outs.append(bb[0])
    return jnp.stack(outs)


# ---------------------------------------------------------------------------
# Initial hidden state: rectangle drawn on a zero image (cv2.rectangle stand-in)
# ---------------------------------------------------------------------------
def make_init_hidden(shape, hidden_chan, init_bb):
    # TODO(synk): cv2.rectangle rasterization approximated with a plain numpy
    # border drawing (thickness ~5, color (0,255,0)); no cv2 dependency.
    H, W = shape
    img = np.zeros((H, W, hidden_chan), dtype=np.float32)
    x0, y0, bw, bh = [int(v) for v in init_bb]
    x1, y1 = x0 + bw, y0 + bh
    ht = 2  # half thickness of a 5-px border
    yy, xx = np.mgrid[0:H, 0:W]
    on_border = (
        ((np.abs(xx - x0) <= ht) | (np.abs(xx - x1) <= ht))
        & (yy >= y0 - ht) & (yy <= y1 + ht)
    ) | (
        ((np.abs(yy - y0) <= ht) | (np.abs(yy - y1) <= ht))
        & (xx >= x0 - ht) & (xx <= x1 + ht)
    )
    if hidden_chan >= 2:
        img[..., 1] = np.where(on_border, 255.0, 0.0)
    return img


if __name__ == "__main__":
    # shape=(16,16), input_chan=3, hidden_chan=4, filter_size=3, seq=4, batch=1
    H = W = 16
    cin, chid, K, seq, pool = 3, 4, 3, 4, 4
    n_hidden = 100
    Hq, Wq = H // pool, W // pool

    key = jax.random.PRNGKey(0)
    ks = jax.random.split(key, 9)
    params = {
        "conv_w": 0.1 * jax.random.normal(ks[0], (4 * chid, cin + chid, K, K), jnp.float32),
        "conv_b": 0.1 * jax.random.normal(ks[1], (4 * chid,), jnp.float32),
        "pool_w": 0.1 * jax.random.normal(ks[2], (1, chid, K, K), jnp.float32),
        "pool_b": 0.1 * jax.random.normal(ks[3], (1,), jnp.float32),
        "fc1_w": 0.1 * jax.random.normal(ks[4], (n_hidden, Hq * Wq), jnp.float32),
        "fc1_b": 0.1 * jax.random.normal(ks[5], (n_hidden,), jnp.float32),
        "fc2_w": 0.1 * jax.random.normal(ks[6], (4, n_hidden), jnp.float32),
        "fc2_b": 0.1 * jax.random.normal(ks[7], (4,), jnp.float32),
    }
    # TODO(synk): loader.getNextFrame() streaming replaced by one pre-stacked
    # frame tensor: (seq, batch=1, cin, H, W) NCHW.
    xs = jax.random.normal(ks[8], (seq, 1, cin, H, W), jnp.float32)

    init_bb = (3.0, 4.0, 8.0, 6.0)
    h0_img = make_init_hidden((H, W), chid, init_bb)                  # (H, W, chid)
    h0_nchw = jnp.asarray(np.moveaxis(h0_img, -1, 0))[None]           # (1, chid, H, W)

    hidden_bb = conv_lstm_forward(xs, h0_nchw, params, filter_size=K, pool=pool)
    hidden_bb = jax.block_until_ready(hidden_bb)
    assert hidden_bb.shape == (seq, 4)

    ref = jax.block_until_ready(ref_forward(xs, h0_nchw, params, filter_size=K, pool=pool))
    np.testing.assert_allclose(np.asarray(hidden_bb), np.asarray(ref),
                               atol=1e-2, rtol=1e-2)
    print("KERNEL_OK")
</pallas_src>

<mosaic_0001>
module attributes {stable_mosaic.version = 11 : i64} {
  func.func @_convlstm_kernel(%arg0: memref<32x1024xbf16, #tpu.memory_space<vmem>>, %arg1: memref<72x256xbf16, #tpu.memory_space<vmem>>, %arg2: memref<72x256xbf16, #tpu.memory_space<vmem>>, %arg3: memref<32x32xbf16, #tpu.memory_space<vmem>>, %arg4: memref<40x72xbf16, #tpu.memory_space<vmem>>, %arg5: memref<32x1xf32, #tpu.memory_space<vmem>>, %arg6: memref<256x128xbf16, #tpu.memory_space<vmem>>, %arg7: memref<1x128xf32, #tpu.memory_space<vmem>>, %arg8: memref<128x4xbf16, #tpu.memory_space<vmem>>, %arg9: memref<1x4xf32, #tpu.memory_space<vmem>>, %arg10: memref<4x4xf32, #tpu.memory_space<vmem>>, %arg11: memref<32x1024xf32, #tpu.memory_space<vmem>>, %arg12: memref<72x256xbf16, #tpu.memory_space<vmem>>, %arg13: memref<4x256xf32, #tpu.memory_space<vmem>>) attributes {dimension_semantics = [], scalar_prefetch = 0 : i64, scratch_operands = 3 : i64, tpu.core_type = #tpu.core_type<tc>} {
    %c0 = arith.constant 0 : index
    %c0_0 = arith.constant 0 : index
    %0 = vector.load %arg3[%c0, %c0_0] : memref<32x32xbf16, #tpu.memory_space<vmem>>, vector<32x32xbf16>
    %c0_1 = arith.constant 0 : index
    %c0_2 = arith.constant 0 : index
    %1 = vector.load %arg0[%c0_1, %c0_2] : memref<32x1024xbf16, #tpu.memory_space<vmem>>, vector<32x1024xbf16>
    %cst = arith.constant dense<0.000000e+00> : vector<32x1024xf32>
    %2 = tpu.matmul %0, %1, %cst {dimension_numbers = #tpu.dot_dimension_numbers<[1], [0], [0], [1], [0, 0, 1, 1], [], []>} : vector<32x32xbf16>, vector<32x1024xbf16>, vector<32x1024xf32> -> vector<32x1024xf32>
    %c0_3 = arith.constant 0 : index
    %c0_4 = arith.constant 0 : index
    %3 = vector.load %arg5[%c0_3, %c0_4] : memref<32x1xf32, #tpu.memory_space<vmem>>, vector<32x1xf32>
    %4 = vector.broadcast %3 : vector<32x1xf32> to vector<32x1024xf32>
    %5 = arith.addf %2, %4 : vector<32x1024xf32>
    %c0_5 = arith.constant 0 : index
    %c0_6 = arith.constant 0 : index
    %6 = vector.load %arg11[%c0_5, %c0_6] : memref<32x1024xf32, #tpu.memory_space<vmem>>, vector<32x1024xf32>
    tpu.vector_store %arg11[%c0_5, %c0_6], %5 {strides = array<i32>} : memref<32x1024xf32, #tpu.memory_space<vmem>>, vector<32x1024xf32>,
    %c0_7 = arith.constant 0 : index
    %c0_8 = arith.constant 0 : index
    %7 = vector.load %arg1[%c0_7, %c0_8] : memref<72x256xbf16, #tpu.memory_space<vmem>>, vector<72x256xbf16>
    %c0_9 = arith.constant 0 : index
    %c0_10 = arith.constant 0 : index
    %8 = vector.load %arg12[%c0_9, %c0_10] : memref<72x256xbf16, #tpu.memory_space<vmem>>, vector<72x256xbf16>
    tpu.vector_store %arg12[%c0_9, %c0_10], %7 {strides = array<i32>} : memref<72x256xbf16, #tpu.memory_space<vmem>>, vector<72x256xbf16>,
    %c0_11 = arith.constant 0 : index
    %c0_12 = arith.constant 0 : index
    %9 = vector.load %arg4[%c0_11, %c0_12] : memref<40x72xbf16, #tpu.memory_space<vmem>>, vector<40x72xbf16>
    %cst_13 = arith.constant 0.000000e+00 : f32
    %10 = vector.broadcast %cst_13 : f32 to vector<8x256xf32>
    %c0_14 = arith.constant 0 : index
    %c0_15 = arith.constant 0 : index
    %11 = vector.load %arg12[%c0_14, %c0_15] : memref<72x256xbf16, #tpu.memory_space<vmem>>, vector<72x256xbf16>
    %cst_16 = arith.constant dense<0.000000e+00> : vector<40x256xf32>
    %12 = tpu.matmul %9, %11, %cst_16 {dimension_numbers = #tpu.dot_dimension_numbers<[1], [0], [0], [1], [0, 0, 1, 1], [], []>} : vector<40x72xbf16>, vector<72x256xbf16>, vector<40x256xf32> -> vector<40x256xf32>
    %13 = vector.extract_strided_slice %12 {offsets = [0, 0], sizes = [32, 256], strides = [1, 1]} : vector<40x256xf32> to vector<32x256xf32>
    %c0_17 = arith.constant 0 : index
    %c0_18 = arith.constant 0 : index
    %14 = vector.load %arg11[%c0_17, %c0_18] : memref<32x1024xf32, #tpu.memory_space<vmem>>, vector<32x256xf32>
    %15 = arith.addf %13, %14 : vector<32x256xf32>
    %16 = vector.extract_strided_slice %15 {offsets = [0, 0], sizes = [8, 256], strides = [1, 1]} : vector<32x256xf32> to vector<8x256xf32>
    %cst_19 = arith.constant 5.000000e-01 : f32
    %17 = vector.broadcast %cst_19 : f32 to vector<8x256xf32>
    %18 = arith.mulf %17, %16 : vector<8x256xf32>
    %19 = math.tanh %18 : vector<8x256xf32>
    %cst_20 = arith.constant 5.000000e-01 : f32
    %20 = vector.broadcast %cst_20 : f32 to vector<8x256xf32>
    %21 = arith.mulf %20, %19 : vector<8x256xf32>
    %cst_21 = arith.constant 5.000000e-01 : f32
    %22 = vector.broadcast %cst_21 : f32 to vector<8x256xf32>
    %23 = arith.addf %21, %22 : vector<8x256xf32>
    %24 = vector.extract_strided_slice %15 {offsets = [8, 0], sizes = [8, 256], strides = [1, 1]} : vector<32x256xf32> to vector<8x256xf32>
    %cst_22 = arith.constant 5.000000e-01 : f32
    %25 = vector.broadcast %cst_22 : f32 to vector<8x256xf32>
    %26 = arith.mulf %25, %24 : vector<8x256xf32>
    %27 = math.tanh %26 : vector<8x256xf32>
    %cst_23 = arith.constant 5.000000e-01 : f32
    %28 = vector.broadcast %cst_23 : f32 to vector<8x256xf32>
    %29 = arith.mulf %28, %27 : vector<8x256xf32>
    %cst_24 = arith.constant 5.000000e-01 : f32
    %30 = vector.broadcast %cst_24 : f32 to vector<8x256xf32>
    %31 = arith.addf %29, %30 : vector<8x256xf32>
    %32 = vector.extract_strided_slice %15 {offsets = [16, 0], sizes = [8, 256], strides = [1, 1]} : vector<32x256xf32> to vector<8x256xf32>
    %33 = math.tanh %32 : vector<8x256xf32>
    %34 = vector.extract_strided_slice %15 {offsets = [24, 0], sizes = [8, 256], strides = [1, 1]} : vector<32x256xf32> to vector<8x256xf32>
    %cst_25 = arith.constant 5.000000e-01 : f32
    %35 = vector.broadcast %cst_25 : f32 to vector<8x256xf32>
    %36 = arith.mulf %35, %34 : vector<8x256xf32>
    %37 = math.tanh %36 : vector<8x256xf32>
    %cst_26 = arith.constant 5.000000e-01 : f32
    %38 = vector.broadcast %cst_26 : f32 to vector<8x256xf32>
    %39 = arith.mulf %38, %37 : vector<8x256xf32>
    %cst_27 = arith.constant 5.000000e-01 : f32
    %40 = vector.broadcast %cst_27 : f32 to vector<8x256xf32>
    %41 = arith.addf %39, %40 : vector<8x256xf32>
    %42 = arith.mulf %23, %10 : vector<8x256xf32>
    %43 = arith.mulf %31, %33 : vector<8x256xf32>
    %44 = arith.addf %42, %43 : vector<8x256xf32>
    %45 = math.tanh %44 : vector<8x256xf32>
    %46 = arith.mulf %41, %45 : vector<8x256xf32>
    %c17_i32 = arith.constant 17 : i32
    %47 = tpu.dynamic_rotate %46 by %c17_i32 dim 1 : vector<8x256xf32>, i32 -> vector<8x256xf32>
    %c16_i32 = arith.constant 16 : i32
    %48 = tpu.dynamic_rotate %46 by %c16_i32 dim 1 : vector<8x256xf32>, i32 -> vector<8x256xf32>
    %c15_i32 = arith.constant 15 : i32
    %49 = tpu.dynamic_rotate %46 by %c15_i32 dim 1 : vector<8x256xf32>, i32 -> vector<8x256xf32>
    %c1_i32 = arith.constant 1 : i32
    %50 = tpu.dynamic_rotate %46 by %c1_i32 dim 1 : vector<8x256xf32>, i32 -> vector<8x256xf32>
    %c255_i32 = arith.constant 255 : i32
    %51 = tpu.dynamic_rotate %46 by %c255_i32 dim 1 : vector<8x256xf32>, i32 -> vector<8x256xf32>
    %c241_i32 = arith.constant 241 : i32
    %52 = tpu.dynamic_rotate %46 by %c241_i32 dim 1 : vector<8x256xf32>, i32 -> vector<8x256xf32>
    %c240_i32 = arith.constant 240 : i32
    %53 = tpu.dynamic_rotate %46 by %c240_i32 dim 1 : vector<8x256xf32>, i32 -> vector<8x256xf32>
    %c239_i32 = arith.constant 239 : i32
    %54 = tpu.dynamic_rotate %46 by %c239_i32 dim 1 : vector<8x256xf32>, i32 -> vector<8x256xf32>
    %55 = tpu.concatenate %47, %48, %49, %50, %46, %51, %52, %53, %54 in 0 : vector<8x256xf32>, vector<8x256xf32>, vector<8x256xf32>, vector<8x256xf32>, vector<8x256xf32>, vector<8x256xf32>, vector<8x256xf32>, vector<8x256xf32>, vector<8x256xf32> -> vector<72x256xf32>
    %56 = arith.truncf %55 : vector<72x256xf32> to vector<72x256xbf16>
    %c0_28 = arith.constant 0 : index
    %c0_29 = arith.constant 0 : index
    %57 = vector.load %arg2[%c0_28, %c0_29] : memref<72x256xbf16, #tpu.memory_space<vmem>>, vector<72x256xbf16>
    %58 = arith.mulf %56, %57 : vector<72x256xbf16>
    %c0_30 = arith.constant 0 : index
    %c0_31 = arith.constant 0 : index
    %59 = vector.load %arg12[%c0_30, %c0_31] : memref<72x256xbf16, #tpu.memory_space<vmem>>, vector<72x256xbf16>
    tpu.vector_store %arg12[%c0_30, %c0_31], %58 {strides = array<i32>} : memref<72x256xbf16, #tpu.memory_space<vmem>>, vector<72x256xbf16>,
    %c0_32 = arith.constant 0 : index
    %c0_33 = arith.constant 0 : index
    %60 = vector.load %arg12[%c0_32, %c0_33] : memref<72x256xbf16, #tpu.memory_space<vmem>>, vector<72x256xbf16>
    %cst_34 = arith.constant dense<0.000000e+00> : vector<40x256xf32>
    %61 = tpu.matmul %9, %60, %cst_34 {dimension_numbers = #tpu.dot_dimension_numbers<[1], [0], [0], [1], [0, 0, 1, 1], [], []>} : vector<40x72xbf16>, vector<72x256xbf16>, vector<40x256xf32> -> vector<40x256xf32>
    %62 = vector.extract_strided_slice %61 {offsets = [32, 0], sizes = [1, 256], strides = [1, 1]} : vector<40x256xf32> to vector<1x256xf32>
    %c0_35 = arith.constant 0 : index
    %c0_36 = arith.constant 0 : index
    %63 = vector.load %arg13[%c0_35, %c0_36] : memref<4x256xf32, #tpu.memory_space<vmem>>, vector<1x256xf32>
    tpu.vector_store %arg13[%c0_35, %c0_36], %62 {strides = array<i32>} : memref<4x256xf32, #tpu.memory_space<vmem>>, vector<1x256xf32>,
    %64 = vector.extract_strided_slice %61 {offsets = [0, 0], sizes = [32, 256], strides = [1, 1]} : vector<40x256xf32> to vector<32x256xf32>
    %c0_37 = arith.constant 0 : index
    %c256 = arith.constant 256 : index
    %65 = vector.load %arg11[%c0_37, %c256] : memref<32x1024xf32, #tpu.memory_space<vmem>>, vector<32x256xf32>
    %66 = arith.addf %64, %65 : vector<32x256xf32>
    %67 = vector.extract_strided_slice %66 {offsets = [0, 0], sizes = [8, 256], strides = [1, 1]} : vector<32x256xf32> to vector<8x256xf32>
    %cst_38 = arith.constant 5.000000e-01 : f32
    %68 = vector.broadcast %cst_38 : f32 to vector<8x256xf32>
    %69 = arith.mulf %68, %67 : vector<8x256xf32>
    %70 = math.tanh %69 : vector<8x256xf32>
    %cst_39 = arith.constant 5.000000e-01 : f32
    %71 = vector.broadcast %cst_39 : f32 to vector<8x256xf32>
    %72 = arith.mulf %71, %70 : vector<8x256xf32>
    %cst_40 = arith.constant 5.000000e-01 : f32
    %73 = vector.broadcast %cst_40 : f32 to vector<8x256xf32>
    %74 = arith.addf %72, %73 : vector<8x256xf32>
    %75 = vector.extract_strided_slice %66 {offsets = [8, 0], sizes = [8, 256], strides = [1, 1]} : vector<32x256xf32> to vector<8x256xf32>
    %cst_41 = arith.constant 5.000000e-01 : f32
    %76 = vector.broadcast %cst_41 : f32 to vector<8x256xf32>
    %77 = arith.mulf %76, %75 : vector<8x256xf32>
    %78 = math.tanh %77 : vector<8x256xf32>
    %cst_42 = arith.constant 5.000000e-01 : f32
    %79 = vector.broadcast %cst_42 : f32 to vector<8x256xf32>
    %80 = arith.mulf %79, %78 : vector<8x256xf32>
    %cst_43 = arith.constant 5.000000e-01 : f32
    %81 = vector.broadcast %cst_43 : f32 to vector<8x256xf32>
    %82 = arith.addf %80, %81 : vector<8x256xf32>
    %83 = vector.extract_strided_slice %66 {offsets = [16, 0], sizes = [8, 256], strides = [1, 1]} : vector<32x256xf32> to vector<8x256xf32>
    %84 = math.tanh %83 : vector<8x256xf32>
    %85 = vector.extract_strided_slice %66 {offsets = [24, 0], sizes = [8, 256], strides = [1, 1]} : vector<32x256xf32> to vector<8x256xf32>
    %cst_44 = arith.constant 5.000000e-01 : f32
    %86 = vector.broadcast %cst_44 : f32 to vector<8x256xf32>
    %87 = arith.mulf %86, %85 : vector<8x256xf32>
    %88 = math.tanh %87 : vector<8x256xf32>
    %cst_45 = arith.constant 5.000000e-01 : f32
    %89 = vector.broadcast %cst_45 : f32 to vector<8x256xf32>
    %90 = arith.mulf %89, %88 : vector<8x256xf32>
    %cst_46 = arith.constant 5.000000e-01 : f32
    %91 = vector.broadcast %cst_46 : f32 to vector<8x256xf32>
    %92 = arith.addf %90, %91 : vector<8x256xf32>
    %93 = arith.mulf %74, %44 : vector<8x256xf32>
    %94 = arith.mulf %82, %84 : vector<8x256xf32>
    %95 = arith.addf %93, %94 : vector<8x256xf32>
    %96 = math.tanh %95 : vector<8x256xf32>
    %97 = arith.mulf %92, %96 : vector<8x256xf32>
    %c17_i32_47 = arith.constant 17 : i32
    %98 = tpu.dynamic_rotate %97 by %c17_i32_47 dim 1 : vector<8x256xf32>, i32 -> vector<8x256xf32>
    %c16_i32_48 = arith.constant 16 : i32
    %99 = tpu.dynamic_rotate %97 by %c16_i32_48 dim 1 : vector<8x256xf32>, i32 -> vector<8x256xf32>
    %c15_i32_49 = arith.constant 15 : i32
    %100 = tpu.dynamic_rotate %97 by %c15_i32_49 dim 1 : vector<8x256xf32>, i32 -> vector<8x256xf32>
    %c1_i32_50 = arith.constant 1 : i32
    %101 = tpu.dynamic_rotate %97 by %c1_i32_50 dim 1 : vector<8x256xf32>, i32 -> vector<8x256xf32>
    %c255_i32_51 = arith.constant 255 : i32
    %102 = tpu.dynamic_rotate %97 by %c255_i32_51 dim 1 : vector<8x256xf32>, i32 -> vector<8x256xf32>
    %c241_i32_52 = arith.constant 241 : i32
    %103 = tpu.dynamic_rotate %97 by %c241_i32_52 dim 1 : vector<8x256xf32>, i32 -> vector<8x256xf32>
    %c240_i32_53 = arith.constant 240 : i32
    %104 = tpu.dynamic_rotate %97 by %c240_i32_53 dim 1 : vector<8x256xf32>, i32 -> vector<8x256xf32>
    %c239_i32_54 = arith.constant 239 : i32
    %105 = tpu.dynamic_rotate %97 by %c239_i32_54 dim 1 : vector<8x256xf32>, i32 -> vector<8x256xf32>
    %106 = tpu.concatenate %98, %99, %100, %101, %97, %102, %103, %104, %105 in 0 : vector<8x256xf32>, vector<8x256xf32>, vector<8x256xf32>, vector<8x256xf32>, vector<8x256xf32>, vector<8x256xf32>, vector<8x256xf32>, vector<8x256xf32>, vector<8x256xf32> -> vector<72x256xf32>
    %107 = arith.truncf %106 : vector<72x256xf32> to vector<72x256xbf16>
    %c0_55 = arith.constant 0 : index
    %c0_56 = arith.constant 0 : index
    %108 = vector.load %arg2[%c0_55, %c0_56] : memref<72x256xbf16, #tpu.memory_space<vmem>>, vector<72x256xbf16>
    %109 = arith.mulf %107, %108 : vector<72x256xbf16>
    %c0_57 = arith.constant 0 : index
    %c0_58 = arith.constant 0 : index
    %110 = vector.load %arg12[%c0_57, %c0_58] : memref<72x256xbf16, #tpu.memory_space<vmem>>, vector<72x256xbf16>
    tpu.vector_store %arg12[%c0_57, %c0_58], %109 {strides = array<i32>} : memref<72x256xbf16, #tpu.memory_space<vmem>>, vector<72x256xbf16>,
    %c0_59 = arith.constant 0 : index
    %c0_60 = arith.constant 0 : index
    %111 = vector.load %arg12[%c0_59, %c0_60] : memref<72x256xbf16, #tpu.memory_space<vmem>>, vector<72x256xbf16>
    %cst_61 = arith.constant dense<0.000000e+00> : vector<40x256xf32>
    %112 = tpu.matmul %9, %111, %cst_61 {dimension_numbers = #tpu.dot_dimension_numbers<[1], [0], [0], [1], [0, 0, 1, 1], [], []>} : vector<40x72xbf16>, vector<72x256xbf16>, vector<40x256xf32> -> vector<40x256xf32>
    %113 = vector.extract_strided_slice %112 {offsets = [32, 0], sizes = [1, 256], strides = [1, 1]} : vector<40x256xf32> to vector<1x256xf32>
    %c1 = arith.constant 1 : index
    %c0_62 = arith.constant 0 : index
    %114 = vector.load %arg13[%c1, %c0_62] : memref<4x256xf32, #tpu.memory_space<vmem>>, vector<1x256xf32>
    tpu.vector_store %arg13[%c1, %c0_62], %113 {strides = array<i32>} : memref<4x256xf32, #tpu.memory_space<vmem>>, vector<1x256xf32>,
    %115 = vector.extract_strided_slice %112 {offsets = [0, 0], sizes = [32, 256], strides = [1, 1]} : vector<40x256xf32> to vector<32x256xf32>
    %c0_63 = arith.constant 0 : index
    %c512 = arith.constant 512 : index
    %116 = vector.load %arg11[%c0_63, %c512] : memref<32x1024xf32, #tpu.memory_space<vmem>>, vector<32x256xf32>
    %117 = arith.addf %115, %116 : vector<32x256xf32>
    %118 = vector.extract_strided_slice %117 {offsets = [0, 0], sizes = [8, 256], strides = [1, 1]} : vector<32x256xf32> to vector<8x256xf32>
    %cst_64 = arith.constant 5.000000e-01 : f32
    %119 = vector.broadcast %cst_64 : f32 to vector<8x256xf32>
    %120 = arith.mulf %119, %118 : vector<8x256xf32>
    %121 = math.tanh %120 : vector<8x256xf32>
    %cst_65 = arith.constant 5.000000e-01 : f32
    %122 = vector.broadcast %cst_65 : f32 to vector<8x256xf32>
    %123 = arith.mulf %122, %121 : vector<8x256xf32>
    %cst_66 = arith.constant 5.000000e-01 : f32
    %124 = vector.broadcast %cst_66 : f32 to vector<8x256xf32>
    %125 = arith.addf %123, %124 : vector<8x256xf32>
    %126 = vector.extract_strided_slice %117 {offsets = [8, 0], sizes = [8, 256], strides = [1, 1]} : vector<32x256xf32> to vector<8x256xf32>
    %cst_67 = arith.constant 5.000000e-01 : f32
    %127 = vector.broadcast %cst_67 : f32 to vector<8x256xf32>
    %128 = arith.mulf %127, %126 : vector<8x256xf32>
    %129 = math.tanh %128 : vector<8x256xf32>
    %cst_68 = arith.constant 5.000000e-01 : f32
    %130 = vector.broadcast %cst_68 : f32 to vector<8x256xf32>
    %131 = arith.mulf %130, %129 : vector<8x256xf32>
    %cst_69 = arith.constant 5.000000e-01 : f32
    %132 = vector.broadcast %cst_69 : f32 to vector<8x256xf32>
    %133 = arith.addf %131, %132 : vector<8x256xf32>
    %134 = vector.extract_strided_slice %117 {offsets = [16, 0], sizes = [8, 256], strides = [1, 1]} : vector<32x256xf32> to vector<8x256xf32>
    %135 = math.tanh %134 : vector<8x256xf32>
    %136 = vector.extract_strided_slice %117 {offsets = [24, 0], sizes = [8, 256], strides = [1, 1]} : vector<32x256xf32> to vector<8x256xf32>
    %cst_70 = arith.constant 5.000000e-01 : f32
    %137 = vector.broadcast %cst_70 : f32 to vector<8x256xf32>
    %138 = arith.mulf %137, %136 : vector<8x256xf32>
    %139 = math.tanh %138 : vector<8x256xf32>
    %cst_71 = arith.constant 5.000000e-01 : f32
    %140 = vector.broadcast %cst_71 : f32 to vector<8x256xf32>
    %141 = arith.mulf %140, %139 : vector<8x256xf32>
    %cst_72 = arith.constant 5.000000e-01 : f32
    %142 = vector.broadcast %cst_72 : f32 to vector<8x256xf32>
    %143 = arith.addf %141, %142 : vector<8x256xf32>
    %144 = arith.mulf %125, %95 : vector<8x256xf32>
    %145 = arith.mulf %133, %135 : vector<8x256xf32>
    %146 = arith.addf %144, %145 : vector<8x256xf32>
    %147 = math.tanh %146 : vector<8x256xf32>
    %148 = arith.mulf %143, %147 : vector<8x256xf32>
    %c17_i32_73 = arith.constant 17 : i32
    %149 = tpu.dynamic_rotate %148 by %c17_i32_73 dim 1 : vector<8x256xf32>, i32 -> vector<8x256xf32>
    %c16_i32_74 = arith.constant 16 : i32
    %150 = tpu.dynamic_rotate %148 by %c16_i32_74 dim 1 : vector<8x256xf32>, i32 -> vector<8x256xf32>
    %c15_i32_75 = arith.constant 15 : i32
    %151 = tpu.dynamic_rotate %148 by %c15_i32_75 dim 1 : vector<8x256xf32>, i32 -> vector<8x256xf32>
    %c1_i32_76 = arith.constant 1 : i32
    %152 = tpu.dynamic_rotate %148 by %c1_i32_76 dim 1 : vector<8x256xf32>, i32 -> vector<8x256xf32>
    %c255_i32_77 = arith.constant 255 : i32
    %153 = tpu.dynamic_rotate %148 by %c255_i32_77 dim 1 : vector<8x256xf32>, i32 -> vector<8x256xf32>
    %c241_i32_78 = arith.constant 241 : i32
    %154 = tpu.dynamic_rotate %148 by %c241_i32_78 dim 1 : vector<8x256xf32>, i32 -> vector<8x256xf32>
    %c240_i32_79 = arith.constant 240 : i32
    %155 = tpu.dynamic_rotate %148 by %c240_i32_79 dim 1 : vector<8x256xf32>, i32 -> vector<8x256xf32>
    %c239_i32_80 = arith.constant 239 : i32
    %156 = tpu.dynamic_rotate %148 by %c239_i32_80 dim 1 : vector<8x256xf32>, i32 -> vector<8x256xf32>
    %157 = tpu.concatenate %149, %150, %151, %152, %148, %153, %154, %155, %156 in 0 : vector<8x256xf32>, vector<8x256xf32>, vector<8x256xf32>, vector<8x256xf32>, vector<8x256xf32>, vector<8x256xf32>, vector<8x256xf32>, vector<8x256xf32>, vector<8x256xf32> -> vector<72x256xf32>
    %158 = arith.truncf %157 : vector<72x256xf32> to vector<72x256xbf16>
    %c0_81 = arith.constant 0 : index
    %c0_82 = arith.constant 0 : index
    %159 = vector.load %arg2[%c0_81, %c0_82] : memref<72x256xbf16, #tpu.memory_space<vmem>>, vector<72x256xbf16>
    %160 = arith.mulf %158, %159 : vector<72x256xbf16>
    %c0_83 = arith.constant 0 : index
    %c0_84 = arith.constant 0 : index
    %161 = vector.load %arg12[%c0_83, %c0_84] : memref<72x256xbf16, #tpu.memory_space<vmem>>, vector<72x256xbf16>
    tpu.vector_store %arg12[%c0_83, %c0_84], %160 {strides = array<i32>} : memref<72x256xbf16, #tpu.memory_space<vmem>>, vector<72x256xbf16>,
    %c0_85 = arith.constant 0 : index
    %c0_86 = arith.constant 0 : index
    %162 = vector.load %arg12[%c0_85, %c0_86] : memref<72x256xbf16, #tpu.memory_space<vmem>>, vector<72x256xbf16>
    %cst_87 = arith.constant dense<0.000000e+00> : vector<40x256xf32>
    %163 = tpu.matmul %9, %162, %cst_87 {dimension_numbers = #tpu.dot_dimension_numbers<[1], [0], [0], [1], [0, 0, 1, 1], [], []>} : vector<40x72xbf16>, vector<72x256xbf16>, vector<40x256xf32> -> vector<40x256xf32>
    %164 = vector.extract_strided_slice %163 {offsets = [32, 0], sizes = [1, 256], strides = [1, 1]} : vector<40x256xf32> to vector<1x256xf32>
    %c2 = arith.constant 2 : index
    %c0_88 = arith.constant 0 : index
    %165 = vector.load %arg13[%c2, %c0_88] : memref<4x256xf32, #tpu.memory_space<vmem>>, vector<1x256xf32>
    tpu.vector_store %arg13[%c2, %c0_88], %164 {strides = array<i32>} : memref<4x256xf32, #tpu.memory_space<vmem>>, vector<1x256xf32>,
    %166 = vector.extract_strided_slice %163 {offsets = [0, 0], sizes = [32, 256], strides = [1, 1]} : vector<40x256xf32> to vector<32x256xf32>
    %c0_89 = arith.constant 0 : index
    %c768 = arith.constant 768 : index
    %167 = vector.load %arg11[%c0_89, %c768] : memref<32x1024xf32, #tpu.memory_space<vmem>>, vector<32x256xf32>
    %168 = arith.addf %166, %167 : vector<32x256xf32>
    %169 = vector.extract_strided_slice %168 {offsets = [0, 0], sizes = [8, 256], strides = [1, 1]} : vector<32x256xf32> to vector<8x256xf32>
    %cst_90 = arith.constant 5.000000e-01 : f32
    %170 = vector.broadcast %cst_90 : f32 to vector<8x256xf32>
    %171 = arith.mulf %170, %169 : vector<8x256xf32>
    %172 = math.tanh %171 : vector<8x256xf32>
    %cst_91 = arith.constant 5.000000e-01 : f32
    %173 = vector.broadcast %cst_91 : f32 to vector<8x256xf32>
    %174 = arith.mulf %173, %172 : vector<8x256xf32>
    %cst_92 = arith.constant 5.000000e-01 : f32
    %175 = vector.broadcast %cst_92 : f32 to vector<8x256xf32>
    %176 = arith.addf %174, %175 : vector<8x256xf32>
    %177 = vector.extract_strided_slice %168 {offsets = [8, 0], sizes = [8, 256], strides = [1, 1]} : vector<32x256xf32> to vector<8x256xf32>
    %cst_93 = arith.constant 5.000000e-01 : f32
    %178 = vector.broadcast %cst_93 : f32 to vector<8x256xf32>
    %179 = arith.mulf %178, %177 : vector<8x256xf32>
    %180 = math.tanh %179 : vector<8x256xf32>
    %cst_94 = arith.constant 5.000000e-01 : f32
    %181 = vector.broadcast %cst_94 : f32 to vector<8x256xf32>
    %182 = arith.mulf %181, %180 : vector<8x256xf32>
    %cst_95 = arith.constant 5.000000e-01 : f32
    %183 = vector.broadcast %cst_95 : f32 to vector<8x256xf32>
    %184 = arith.addf %182, %183 : vector<8x256xf32>
    %185 = vector.extract_strided_slice %168 {offsets = [16, 0], sizes = [8, 256], strides = [1, 1]} : vector<32x256xf32> to vector<8x256xf32>
    %186 = math.tanh %185 : vector<8x256xf32>
    %187 = vector.extract_strided_slice %168 {offsets = [24, 0], sizes = [8, 256], strides = [1, 1]} : vector<32x256xf32> to vector<8x256xf32>
    %cst_96 = arith.constant 5.000000e-01 : f32
    %188 = vector.broadcast %cst_96 : f32 to vector<8x256xf32>
    %189 = arith.mulf %188, %187 : vector<8x256xf32>
    %190 = math.tanh %189 : vector<8x256xf32>
    %cst_97 = arith.constant 5.000000e-01 : f32
    %191 = vector.broadcast %cst_97 : f32 to vector<8x256xf32>
    %192 = arith.mulf %191, %190 : vector<8x256xf32>
    %cst_98 = arith.constant 5.000000e-01 : f32
    %193 = vector.broadcast %cst_98 : f32 to vector<8x256xf32>
    %194 = arith.addf %192, %193 : vector<8x256xf32>
    %195 = arith.mulf %176, %146 : vector<8x256xf32>
    %196 = arith.mulf %184, %186 : vector<8x256xf32>
    %197 = arith.addf %195, %196 : vector<8x256xf32>
    %198 = math.tanh %197 : vector<8x256xf32>
    %199 = arith.mulf %194, %198 : vector<8x256xf32>
    %c17_i32_99 = arith.constant 17 : i32
    %200 = tpu.dynamic_rotate %199 by %c17_i32_99 dim 1 : vector<8x256xf32>, i32 -> vector<8x256xf32>
    %c16_i32_100 = arith.constant 16 : i32
    %201 = tpu.dynamic_rotate %199 by %c16_i32_100 dim 1 : vector<8x256xf32>, i32 -> vector<8x256xf32>
    %c15_i32_101 = arith.constant 15 : i32
    %202 = tpu.dynamic_rotate %199 by %c15_i32_101 dim 1 : vector<8x256xf32>, i32 -> vector<8x256xf32>
    %c1_i32_102 = arith.constant 1 : i32
    %203 = tpu.dynamic_rotate %199 by %c1_i32_102 dim 1 : vector<8x256xf32>, i32 -> vector<8x256xf32>
    %c255_i32_103 = arith.constant 255 : i32
    %204 = tpu.dynamic_rotate %199 by %c255_i32_103 dim 1 : vector<8x256xf32>, i32 -> vector<8x256xf32>
    %c241_i32_104 = arith.constant 241 : i32
    %205 = tpu.dynamic_rotate %199 by %c241_i32_104 dim 1 : vector<8x256xf32>, i32 -> vector<8x256xf32>
    %c240_i32_105 = arith.constant 240 : i32
    %206 = tpu.dynamic_rotate %199 by %c240_i32_105 dim 1 : vector<8x256xf32>, i32 -> vector<8x256xf32>
    %c239_i32_106 = arith.constant 239 : i32
    %207 = tpu.dynamic_rotate %199 by %c239_i32_106 dim 1 : vector<8x256xf32>, i32 -> vector<8x256xf32>
    %208 = tpu.concatenate %200, %201, %202, %203, %199, %204, %205, %206, %207 in 0 : vector<8x256xf32>, vector<8x256xf32>, vector<8x256xf32>, vector<8x256xf32>, vector<8x256xf32>, vector<8x256xf32>, vector<8x256xf32>, vector<8x256xf32>, vector<8x256xf32> -> vector<72x256xf32>
    %209 = arith.truncf %208 : vector<72x256xf32> to vector<72x256xbf16>
    %c0_107 = arith.constant 0 : index
    %c0_108 = arith.constant 0 : index
    %210 = vector.load %arg2[%c0_107, %c0_108] : memref<72x256xbf16, #tpu.memory_space<vmem>>, vector<72x256xbf16>
    %211 = arith.mulf %209, %210 : vector<72x256xbf16>
    %c0_109 = arith.constant 0 : index
    %c0_110 = arith.constant 0 : index
    %212 = vector.load %arg12[%c0_109, %c0_110] : memref<72x256xbf16, #tpu.memory_space<vmem>>, vector<72x256xbf16>
    tpu.vector_store %arg12[%c0_109, %c0_110], %211 {strides = array<i32>} : memref<72x256xbf16, #tpu.memory_space<vmem>>, vector<72x256xbf16>,
    %c0_111 = arith.constant 0 : index
    %c0_112 = arith.constant 0 : index
    %213 = vector.load %arg12[%c0_111, %c0_112] : memref<72x256xbf16, #tpu.memory_space<vmem>>, vector<72x256xbf16>
    %cst_113 = arith.constant dense<0.000000e+00> : vector<40x256xf32>
    %214 = tpu.matmul %9, %213, %cst_113 {dimension_numbers = #tpu.dot_dimension_numbers<[1], [0], [0], [1], [0, 0, 1, 1], [], []>} : vector<40x72xbf16>, vector<72x256xbf16>, vector<40x256xf32> -> vector<40x256xf32>
    %215 = vector.extract_strided_slice %214 {offsets = [32, 0], sizes = [1, 256], strides = [1, 1]} : vector<40x256xf32> to vector<1x256xf32>
    %c3 = arith.constant 3 : index
    %c0_114 = arith.constant 0 : index
    %216 = vector.load %arg13[%c3, %c0_114] : memref<4x256xf32, #tpu.memory_space<vmem>>, vector<1x256xf32>
    tpu.vector_store %arg13[%c3, %c0_114], %215 {strides = array<i32>} : memref<4x256xf32, #tpu.memory_space<vmem>>, vector<1x256xf32>,
    %c0_115 = arith.constant 0 : index
    %c0_116 = arith.constant 0 : index
    %217 = vector.load %arg13[%c0_115, %c0_116] : memref<4x256xf32, #tpu.memory_space<vmem>>, vector<4x256xf32>
    %c255_i32_117 = arith.constant 255 : i32
    %218 = tpu.dynamic_rotate %217 by %c255_i32_117 dim 1 : vector<4x256xf32>, i32 -> vector<4x256xf32>
    %219 = arith.maximumf %217, %218 : vector<4x256xf32>
    %c254_i32 = arith.constant 254 : i32
    %220 = tpu.dynamic_rotate %219 by %c254_i32 dim 1 : vector<4x256xf32>, i32 -> vector<4x256xf32>
    %221 = arith.maximumf %219, %220 : vector<4x256xf32>
    %c240_i32_118 = arith.constant 240 : i32
    %222 = tpu.dynamic_rotate %221 by %c240_i32_118 dim 1 : vector<4x256xf32>, i32 -> vector<4x256xf32>
    %223 = arith.maximumf %221, %222 : vector<4x256xf32>
    %c224_i32 = arith.constant 224 : i32
    %224 = tpu.dynamic_rotate %223 by %c224_i32 dim 1 : vector<4x256xf32>, i32 -> vector<4x256xf32>
    %225 = arith.maximumf %223, %224 : vector<4x256xf32>
    %226 = arith.truncf %225 : vector<4x256xf32> to vector<4x256xbf16>
    %c0_119 = arith.constant 0 : index
    %c0_120 = arith.constant 0 : index
    %227 = vector.load %arg6[%c0_119, %c0_120] : memref<256x128xbf16, #tpu.memory_space<vmem>>, vector<256x128xbf16>
    %cst_121 = arith.constant dense<0.000000e+00> : vector<4x128xf32>
    %228 = tpu.matmul %226, %227, %cst_121 {dimension_numbers = #tpu.dot_dimension_numbers<[1], [0], [0], [1], [0, 0, 1, 1], [], []>} : vector<4x256xbf16>, vector<256x128xbf16>, vector<4x128xf32> -> vector<4x128xf32>
    %c0_122 = arith.constant 0 : index
    %c0_123 = arith.constant 0 : index
    %229 = vector.load %arg7[%c0_122, %c0_123] : memref<1x128xf32, #tpu.memory_space<vmem>>, vector<1x128xf32>
    %230 = vector.broadcast %229 : vector<1x128xf32> to vector<4x128xf32>
    %231 = arith.addf %228, %230 : vector<4x128xf32>
    %232 = arith.truncf %231 : vector<4x128xf32> to vector<4x128xbf16>
    %c0_124 = arith.constant 0 : index
    %c0_125 = arith.constant 0 : index
    %233 = vector.load %arg8[%c0_124, %c0_125] : memref<128x4xbf16, #tpu.memory_space<vmem>>, vector<128x4xbf16>
    %cst_126 = arith.constant dense<0.000000e+00> : vector<4x4xf32>
    %234 = tpu.matmul %232, %233, %cst_126 {dimension_numbers = #tpu.dot_dimension_numbers<[1], [0], [0], [1], [0, 0, 1, 1], [], []>} : vector<4x128xbf16>, vector<128x4xbf16>, vector<4x4xf32> -> vector<4x4xf32>
    %c0_127 = arith.constant 0 : index
    %c0_128 = arith.constant 0 : index
    %235 = vector.load %arg9[%c0_127, %c0_128] : memref<1x4xf32, #tpu.memory_space<vmem>>, vector<1x4xf32>
    %236 = vector.broadcast %235 : vector<1x4xf32> to vector<4x4xf32>
    %237 = arith.addf %234, %236 : vector<4x4xf32>
    %c0_129 = arith.constant 0 : index
    %c0_130 = arith.constant 0 : index
    %238 = vector.load %arg10[%c0_129, %c0_130] : memref<4x4xf32, #tpu.memory_space<vmem>>, vector<4x4xf32>
    tpu.vector_store %arg10[%c0_129, %c0_130], %237 {strides = array<i32>} : memref<4x4xf32, #tpu.memory_space<vmem>>, vector<4x4xf32>,
    return
  }
}

</mosaic_0001>

<bundles_post_ra>
// kernel: tpu_custom_call.1
= control target key start
LH: loop header
LB: loop body
LE: loop exit
PB: predicated region body
PF: predicated region fallthrough
CT: control target
= control target key end

     0   :  { %15 = vsyncpa [#allocation6], 0  ;;  %s3777_s0 = inlined_call_operand.hbm [shape: bf16[32,1024], index: 0, kind: input, shape index: {}]   ;;  %s3778_s1 = inlined_call_operand.vmem [shape: bf16[72,256], index: 1, kind: input, shape index: {}]   ;;  %s3779_s2 = inlined_call_operand.hbm [shape: bf16[72,256], index: 2, kind: input, shape index: {}]   ;;  %s3780_s3 = inlined_call_operand.hbm [shape: bf16[32,32], index: 3, kind: input, shape index: {}]   ;;  %s3781_s4 = inlined_call_operand.vmem [shape: bf16[40,72], index: 4, kind: input, shape index: {}]   ;;  %s3782_s5 = inlined_call_operand.vmem [shape: f32[32,1], index: 5, kind: input, shape index: {}]   ;;  %s3783_s6 = inlined_call_operand.hbm [shape: bf16[256,128], index: 6, kind: input, shape index: {}]   ;;  %s3784_s7 = inlined_call_operand.vmem [shape: f32[1,128], index: 7, kind: input, shape index: {}]   ;;  %s3785_s8 = inlined_call_operand.vmem [shape: bf16[128,4], index: 8, kind: input, shape index: {}]   ;;  %s3786_s9 = inlined_call_operand.vmem [shape: f32[1,4], index: 9, kind: input, shape index: {}]   ;;  %s3787_s10 = inlined_call_operand.hbm [shape: f32[4,4], index: 10, kind: output, shape index: {}]  }
   0x1   :  { %16 = vsyncpa [#allocation9], 0 }
   0x2   :  { %17 = vsyncpa [#allocation12], 0  ;;  %s38_s15 = sshll.u32 %s3779_s2, 4  ;;  %s39_s15 = int_to_ptr.hbm [resolvable:$true] %s38_s15 }
   0x3   :  { %18 = vsyncpa [#allocation7], 0  ;;  %s3003_s16 = smov [#allocation8]   ;;  %s23_s20 = sshll.u32 %s3777_s0, 4  ;;  %s24_s20 = int_to_ptr.hbm [resolvable:$true] %s23_s20 }
   0x4   :  { %s40_s17 = sshll.u32 %s3003_s16, 4  ;;  %s3004_s21 = smov 128   ;;  %s41_s17 = int_to_ptr.vmem [resolvable:$true] %s40_s17 }
   0x5   :  { %s3005_s22 = smov 8   ;;  %s3006_s23 = smov [#allocation5]  }
   0x6   :  { %46 = dma.hbm_to_vmem [thread:$0]  %s39_s15, 1152, %s41_s17, [#allocation9], %s3004_s21, %s3004_s21, %s3005_s22  }
   0x7   :  { %s25_s24 = sshll.u32 %s3006_s23, 4  ;;  %s3007_s25 = smov 512   ;;  %s26_s24 = int_to_ptr.vmem [resolvable:$true] %s25_s24 }
   0x8   :  { %s3008_s26 = smov 32   ;;  %s51_s28 = sshll.u32 %s3780_s3, 4  ;;  %s52_s28 = int_to_ptr.hbm [resolvable:$true] %s51_s28 }
   0x9   :  { %31 = dma.hbm_to_vmem [thread:$0]  %s24_s20, 2048, %s26_s24, [#allocation6], %s3007_s25, %s3007_s25, %s3008_s26  }
   0xa   :  { %s3009_s29 = smov [#allocation10]   ;;  %s68_s12 = sshll.u32 %s3783_s6, 4  ;;  %s69_s12 = int_to_ptr.hbm [resolvable:$true] %s68_s12 }
   0xb   :  { %s53_s30 = sshll.u32 %s3009_s29, 4  ;;  %s3010_s13 = smov 64   ;;  %s54_s30 = int_to_ptr.vmem [resolvable:$true] %s53_s30 }
   0xc   :  { %s3011_s14 = smov 4   ;;  %s3012_s15 = smov [#allocation11]  }
   0xd   :  { %59 = dma.hbm_to_vmem [thread:$0]  %s52_s28, 256, %s54_s30, [#allocation9], %s3010_s13, %s3010_s13, %s3011_s14  }
   0xe   :  { %s70_s16 = sshll.u32 %s3012_s15, 4  ;;  %s71_s16 = int_to_ptr.vmem [resolvable:$true] %s70_s16 }
   0xf   :  { %76 = dma.hbm_to_vmem [thread:$0]  %s69_s12, 2048, %s71_s16, [#allocation12], %s3010_s13, %s3010_s13, %s3011_s14  }
  0x10   :  { %2995 = dma.done.wait [#allocation6], 2048  }
  0x11   :  { %2996 = vsyncadd [#allocation6], 4294965248 }
  0x12   :  { %2997 = dma.done.wait [#allocation9], 1408  }
  0x13   :  { %2998 = vsyncadd [#allocation9], 4294965888 }
  0x14   :  { %2999 = dma.done.wait [#allocation12], 2048  }
  0x15   :  { %3000 = vsyncadd [#allocation12], 4294965248  ;;  %v3013_v0 = vmov 0   ;;  %v2180_v1 = vld [vmem:[#allocation5 + $0x40] sm:$0xf]  ;;  %v3092_v15 = vld [vmem:[#allocation10] sm:$0xff] }
  0x16   :  { %2628 = vset.pattern.permute.xlu0 %v3013_v0  ;;  %2629 = vset.pattern.permute.xlu1 %v3013_v0  ;;  %v2534_v2 = vld [vmem:[#allocation5 + $0x5c] sm:$0xf0]  ;;  %v2530_v3 = vld [vmem:[#allocation5 + $0x44] sm:$0xf]  ;;  %v2188_v12 = vld [vmem:[#allocation5 + $0x48] sm:$0xf] }
  0x17   :  { %v2181_v4 = vor.u32 %v2534_v2, %v2180_v1  ;;  %v2182_v5 = vld [vmem:[#allocation5 + $0x60] sm:$0xf0]  ;;  %v2148_v6 = vld [vmem:[#allocation5] sm:$0xf]  ;;  %v2535_v13 = vld [vmem:[#allocation5 + $0x64] sm:$0xf0] }
  0x18   :  { %v2526_v7 = vld [vmem:[#allocation5 + $0x1c] sm:$0xf0]  ;;  %v2185_v8 = vor.u32 %v2530_v3, %v2182_v5  ;;  %v2522_v9 = vld [vmem:[#allocation5 + $0x4] sm:$0xf]  ;;  %v3094_v16 = vld [vmem:[#allocation10 + $0x8] sm:$0xff]  ;;  %v2189_v17 = vor.u32 %v2535_v13, %v2188_v12  ;;  %vm234_vm0 = vcmask 261120  }
  0x19   :  { %v2150_v10 = vld [vmem:[#allocation5 + $0x20] sm:$0xf0]  ;;  %247 = vmatpush.bf16.msra.mxu0 %v2181_v4  ;;  %2604 = vmatpush.bf16.msra.mxu3 %v2181_v4  ;;  %v2149_v11 = vor.u32 %v2526_v7, %v2148_v6  ;;  %v2531_v18 = vld [vmem:[#allocation5 + $0x4c] sm:$0xf]  ;;  %v2196_v20 = vld [vmem:[#allocation5 + $0x50] sm:$0xf] }
  0x1a   :  { %266 = vmatpush.bf16.msra.mxu1 %v2185_v8  ;;  %v2153_v14 = vor.u32 %v2522_v9, %v2150_v10  ;;  %v2190_v19 = vld [vmem:[#allocation5 + $0x68] sm:$0xf0]  ;;  %v2536_v22 = vld [vmem:[#allocation5 + $0x6c] sm:$0xf0]  ;;  %v2156_v24 = vld [vmem:[#allocation5 + $0x8] sm:$0xf]  ;;  %285 = vmatpush.bf16.msra.mxu2 %v2189_v17 }
  0x1b   :  { %v2193_v21 = vor.u32 %v2531_v18, %v2190_v19  ;;  %v120_v23 = vld [vmem:[%s3782_s5] sm:$0xff]  ;;  %v2197_v25 = vor.u32 %v2536_v22, %v2196_v20  ;;  %v2164_v30 = vld [vmem:[#allocation5 + $0x10] sm:$0xf]  ;;  %v2532_v33 = vld [vmem:[#allocation5 + $0x54] sm:$0xf]  ;;  %vm525_vm1 = vcmask 1043456  }
  0x1c   :  { %126 = vperm.xlu0 %2628, %v120_v23   ;;  %v2527_v26 = vld [vmem:[#allocation5 + $0x24] sm:$0xf0]  ;;  %v2523_v27 = vld [vmem:[#allocation5 + $0xc] sm:$0xf]  ;;  %v2528_v31 = vld [vmem:[#allocation5 + $0x2c] sm:$0xf0] }
  0x1d   :  { %v2158_v28 = vld [vmem:[#allocation5 + $0x28] sm:$0xf0]  ;;  %248 = vmatpush.bf16.msra.mxu0 %v2149_v11  ;;  %2605 = vmatpush.bf16.msra.mxu3 %v2149_v11  ;;  %v2157_v29 = vor.u32 %v2527_v26, %v2156_v24  ;;  %v2198_v34 = vld [vmem:[#allocation5 + $0x70] sm:$0xf0]  ;;  %v122_v35 = vld [vmem:[%s3782_s5 + $0x10] sm:$0xff]  ;;  %v2165_v36 = vor.u32 %v2528_v31, %v2164_v30  ;;  %vm515_vm2 = vcmask 588800  }
  0x1e   :  { %267 = vmatpush.bf16.msra.mxu1 %v2153_v14  ;;  %v2161_v32 = vor.u32 %v2523_v27, %v2158_v28  ;;  %v2201_v37 = vor.u32 %v2532_v33, %v2198_v34  ;;  %136 = vperm.xlu1 %2629, %v122_v35   ;;  %v2524_v38 = vld [vmem:[#allocation5 + $0x14] sm:$0xf]  ;;  %v433_v40 = vld [vmem:[%s3778_s1 + $0x40] sm:$0xff]  ;;  %v431_v42 = vld [vmem:[%s3778_s1 + $0x30] sm:$0xff]  ;;  %s3014_s19 = smov 127   ;;  %s3015_s20 = smov 112  }
  0x1f   :  { %v2166_v39 = vld [vmem:[#allocation5 + $0x30] sm:$0xf0]  ;;  %v495_v41 = vunpack.c.l.b16 %v433_v40  ;;  %v432_v43 = vld [vmem:[%s3778_s1 + $0x38] sm:$0xff]  ;;  %v429_v44 = vld [vmem:[%s3778_s1 + $0x20] sm:$0xff]  ;;  %286 = vmatpush.bf16.msra.mxu2 %v2157_v29  ;;  %440 = vst [vmem:[#allocation3 + $0x30] sm:$0xff] %v431_v42  ;;  %v496_v48 = vunpack.c.h.b16 %v433_v40  ;;  %s3016_s21 = smov 111  }
  0x20   :  { %2210 = vmatmul.msk.bf16.vlgmr.msra.gmra.mxu0 %vm234_vm0, %v3092_v15  ;;  %2211 = vmatmul.msk.bf16.vlgmr.msra.gmra.mxu3 %vm234_vm0, %v3094_v16  ;;  %v121_v45 = vld [vmem:[%s3782_s5 + $0x8] sm:$0xff]  ;;  %v2204_v47 = vld [vmem:[#allocation5 + $0x58] sm:$0xf]  ;;  %v2169_v49 = vor.u32 %v2524_v38, %v2166_v39  ;;  %441 = vst [vmem:[#allocation3 + $0x38] sm:$0xff] %v432_v43  ;;  %v123_v51 = vld [vmem:[%s3782_s5 + $0x18] sm:$0xff]  ;;  %s3017_s22 = smov 17  }
  0x21   :  { %304 = vmatpush.bf16.msrb.mxu3 %v2193_v21  ;;  %323 = vmatpush.bf16.msrb.mxu0 %v2197_v25  ;;  %v430_v46 = vld [vmem:[%s3778_s1 + $0x28] sm:$0xff]  ;;  %v505_v50 = vpack.c.b16 %v495_v41, %v495_v41  ;;  %v2537_v52 = vld [vmem:[#allocation5 + $0x74] sm:$0xf0]  ;;  %v2533_v53 = vld [vmem:[#allocation5 + $0x5c] sm:$0xf]  ;;  %438 = vst [vmem:[#allocation3 + $0x20] sm:$0xff] %v429_v44  ;;  %v506_v59 = vpack.c.b16 %v496_v48, %v496_v48 }
  0x22   :  { %2212 = vmatmul.msk.bf16.vlgmr.msra.gmra.mxu1 %vm234_vm0, %v3092_v15  ;;  %v427_v54 = vld [vmem:[%s3778_s1 + $0x10] sm:$0xff]  ;;  %v2205_v55 = vor.u32 %v2537_v52, %v2204_v47  ;;  %v428_v57 = vld [vmem:[%s3778_s1 + $0x18] sm:$0xff]  ;;  %2214 = vmatmul.msk.bf16.vlgmr.msra.gmra.mxu2 %vm234_vm0, %v3092_v15  ;;  %439 = vst [vmem:[#allocation3 + $0x28] sm:$0xff] %v430_v46  ;;  %v425_v2 = vld [vmem:[%s3778_s1] sm:$0xff]  ;;  %s3018_s23 = smov 1   ;;  %s3019_s24 = smov 113  }
  0x23   :  { %342 = vmatpush.bf16.msrb.mxu1 %v2201_v37  ;;  %v2206_v56 = vld [vmem:[#allocation5 + $0x78] sm:$0xf0]  ;;  %v2172_v58 = vld [vmem:[#allocation5 + $0x18] sm:$0xf]  ;;  %v527_v60 = vsel %vm525_vm1, %v505_v50, 0  ;;  %436 = vst [vmem:[#allocation3 + $0x10] sm:$0xff] %v427_v54 }
  0x24   :  { %131 = vperm.xlu0 %2628, %v121_v45   ;;  %v2209_v61 = vor.u32 %v2533_v53, %v2206_v56  ;;  %v2529_v62 = vld [vmem:[#allocation5 + $0x34] sm:$0xf0]  ;;  %v2525_v63 = vld [vmem:[#allocation5 + $0x1c] sm:$0xf]  ;;  %361 = vmatpush.bf16.msrb.mxu2 %v2205_v55  ;;  %v426_v3 = vld [vmem:[%s3778_s1 + $0x8] sm:$0xff]  ;;  %v530_v4 = vsel %vm525_vm1, %v506_v59, 0 }
  0x25   :  { %305 = vmatpush.bf16.msrb.mxu3 %v2161_v32  ;;  %324 = vmatpush.bf16.msrb.mxu0 %v2165_v36  ;;  %v2173_v0 = vor.u32 %v2529_v62, %v2172_v58  ;;  %v2174_v1 = vld [vmem:[#allocation5 + $0x38] sm:$0xf0]  ;;  %437 = vst [vmem:[#allocation3 + $0x18] sm:$0xff] %v428_v57  ;;  %v3164_v32 = vld [vmem:[%s3781_s4] sm:$0xff]  ;;  %v3177_v33 = vld [vmem:[%s3781_s4 + $0x8] sm:$0xff]  ;;  %s3020_s25 = smov 15  }
  0x26   :  { %v2177_v5 = vor.u32 %v2525_v63, %v2174_v1  ;;  %141 = vperm.xlu1 %2629, %v123_v51   ;;  %434 = vst [vmem:[#allocation3] sm:$0xff] %v425_v2  ;;  %v2260_v6 = vld [vmem:[#allocation3 + $0x30] sm:$0xf]  ;;  %v2546_v14 = vld [vmem:[#allocation3 + $0x34] sm:$0xf]  ;;  %s3021_s26 = smov 16  }
  0x27   :  { %343 = vmatpush.bf16.msrb.mxu1 %v2169_v49  ;;  %435 = vst [vmem:[#allocation3 + $0x8] sm:$0xff] %v426_v3  ;;  %v2547_v7 = vld [vmem:[#allocation3 + $0x34] sm:$0xf0]  ;;  %v2262_v17 = vld [vmem:[#allocation3 + $0x38] sm:$0xf0]  ;;  %vm885_vm11 = vcmask 1040384  }
  0x28   :  { %362 = vmatpush.bf16.msrb.mxu2 %v2173_v0  ;;  %v2261_v8 = vor.u32 %v2547_v7, %v2260_v6  ;;  %v2252_v9 = vld [vmem:[#allocation3 + $0x20] sm:$0xf]  ;;  %v2265_v19 = vor.u32 %v2546_v14, %v2262_v17  ;;  %v2544_v20 = vld [vmem:[#allocation3 + $0x24] sm:$0xf]  ;;  %s3023_s13 = smov 96   ;;  %s3024_s29 = smov [#allocation13]  }
  0x29   :  { %535 = vmatpush.bf16.msra.mxu0 %v527_v60  ;;  %380 = vmatpush.bf16.msra.mxu3 %v2209_v61  ;;  %v2545_v10 = vld [vmem:[#allocation3 + $0x24] sm:$0xf0]  ;;  %v2254_v21 = vld [vmem:[#allocation3 + $0x28] sm:$0xf0]  ;;  %s2124_s30 = sshll.u32 %s3024_s29, 4  ;;  %s2126_s0 = sshll.u32 %s3787_s10, 4  ;;  %s2125_s30 = int_to_ptr.vmem [resolvable:$true] %s2124_s30  ;;  %s2127_s0 = int_to_ptr.hbm [resolvable:$true] %s2126_s0 }
  0x2a   :  { %v2253_v11 = vor.u32 %v2545_v10, %v2252_v9  ;;  %v2244_v12 = vld [vmem:[#allocation3 + $0x10] sm:$0xf]  ;;  %v2257_v24 = vor.u32 %v2544_v20, %v2254_v21  ;;  %v2542_v25 = vld [vmem:[#allocation3 + $0x14] sm:$0xf]  ;;  %vm2117_vm15 = vcmask 27648  }
  0x2b   :  { %557 = vmatpush.bf16.msra.mxu1 %v530_v4 }
  0x2c   :  { %v2543_v13 = vld [vmem:[#allocation3 + $0x14] sm:$0xf0]  ;;  %v2246_v26 = vld [vmem:[#allocation3 + $0x18] sm:$0xf0] }
  0x2d   :  { %381 = vmatpush.bf16.msra.mxu3 %v2177_v5  ;;  %536 = vmatpush.bf16.msra.mxu0 %v2261_v8  ;;  %v2245_v18 = vor.u32 %v2543_v13, %v2244_v12  ;;  %v2236_v22 = vld [vmem:[#allocation3] sm:$0xf]  ;;  %v2249_v28 = vor.u32 %v2542_v25, %v2246_v26  ;;  %v2540_v29 = vld [vmem:[#allocation3 + $0x4] sm:$0xf] }
  0x2e   :  { %v2541_v23 = vld [vmem:[#allocation3 + $0x4] sm:$0xf0]  ;;  %v2238_v30 = vld [vmem:[#allocation3 + $0x8] sm:$0xf0] }
  0x2f   :  { %558 = vmatpush.bf16.msra.mxu1 %v2265_v19  ;;  %v2237_v27 = vor.u32 %v2541_v23, %v2236_v22  ;;  %v2241_v31 = vor.u32 %v2540_v29, %v2238_v30 }
  0x30   :  { %2216 = vmatmul.msk.bf16.vlgmr.msrb.gmra.mxu3 %vm234_vm0, %v3092_v15  ;;  %2218 = vmatmul.msk.bf16.vlgmr.msrb.gmra.mxu0 %vm234_vm0, %v3092_v15 }
  0x31   :  { %537 = vmatpush.bf16.msra.mxu0 %v2253_v11 }
  0x32   :  { %2213 = vmatmul.msk.bf16.gmra.mxu1 %vm234_vm0, %v3094_v16  ;;  %2215 = vmatmul.msk.bf16.gmra.mxu2 %vm234_vm0, %v3094_v16 }
  0x33   :  { %559 = vmatpush.bf16.msra.mxu1 %v2257_v24 }
  0x35   :  { %538 = vmatpush.bf16.msra.mxu0 %v2245_v18 }
  0x37   :  { %560 = vmatpush.bf16.msra.mxu1 %v2249_v28 }
  0x39   :  { %539 = vmatpush.bf16.msra.mxu0 %v2237_v27 }
  0x3b   :  { %561 = vmatpush.bf16.msra.mxu1 %v2241_v31 }
  0x40   :  { %2217 = vmatmul.msk.bf16.gmra.mxu3 %vm234_vm0, %v3094_v16  ;;  %2219 = vmatmul.msk.bf16.gmra.mxu0 %vm234_vm0, %v3094_v16 }
  0x42   :  { %2220 = vmatmul.msk.bf16.vlgmr.msrb.gmra.mxu1 %vm234_vm0, %v3092_v15  ;;  %2222 = vmatmul.msk.bf16.vlgmr.msrb.gmra.mxu2 %vm234_vm0, %v3092_v15 }
  0x50   :  { %2224 = vmatmul.msk.bf16.vlgmr.msra.gmra.mxu3 %vm234_vm0, %v3092_v15  ;;  %2266 = vmatmul.msk.bf16.vlgmr.msra.gmra.mxu0 %vm515_vm2, %v3164_v32 }
  0x52   :  { %2221 = vmatmul.msk.bf16.gmra.mxu1 %vm234_vm0, %v3094_v16  ;;  %2223 = vmatmul.msk.bf16.gmra.mxu2 %vm234_vm0, %v3094_v16 }
  0x60   :  { %2225 = vmatmul.msk.bf16.gmra.mxu3 %vm234_vm0, %v3094_v16  ;;  %2267 = vmatmul.msk.bf16.gmra.mxu0 %vm515_vm2, %v3177_v33 }
  0x62   :  { %2269 = vmatmul.msk.bf16.vlgmr.msra.gmra.mxu1 %vm515_vm2, %v3164_v32 }
  0x72   :  { %2270 = vmatmul.msk.bf16.gmra.mxu1 %vm515_vm2, %v3177_v33 }
  0x8e   :  { %v127_v38 = vpop.permute.xlu0 %126 }
  0x90   :  { %v3228_v8 = vpop.permute.xlu1 %136 }
  0x96   :  { %v3225_v4 = vpop.permute.xlu0 %131 }
  0x98   :  { %v3232_v22 = vpop.permute.xlu1 %141 }
  0x9d   :  { %v250_v15 = vpop.f32.mrf.mxu0 }
  0x9e   :  { %v251_v3 = vadd.f32 %v250_v15, %v127_v38 }
  0x9f   :  { %v269_v34 = vpop.f32.mrf.mxu1 }
  0xa0   :  { %v270_v6 = vadd.f32 %v269_v34, %v127_v38 }
  0xa3   :  { %v255_v35 = vpop.f32.mrf.mxu3 }
  0xa4   :  { %v256_v19 = vadd.f32 %v255_v35, %v3228_v8 }
  0xa5   :  { %v252_v36 = vpop.f32.mrf.mxu0  ;;  %v288_v39 = vpop.f32.mrf.mxu2 }
  0xa6   :  { %v3187_v40 = vadd.f32 %v288_v39, %v127_v38  ;;  %v253_v5 = vadd.f32 %v252_v36, %v3225_v4 }
  0xa7   :  { %v271_v37 = vpop.f32.mrf.mxu1 }
  0xa8   :  { %v272_v18 = vadd.f32 %v271_v37, %v3225_v4 }
  0xab   :  { %v257_v41 = vpop.f32.mrf.mxu3 }
  0xac   :  { %v258_v24 = vadd.f32 %v257_v41, %v3232_v22 }
  0xad   :  { %v326_v16 = vpop.f32.mrf.mxu0  ;;  %v3191_v44 = vpop.f32.mrf.mxu2 }
  0xae   :  { %v3189_v43 = vadd.f32 %v326_v16, %v127_v38 }
  0xaf   :  { %v274_v42 = vpop.f32.mrf.mxu1 }
  0xb0   :  { %v275_v30 = vadd.f32 %v274_v42, %v3228_v8 }
  0xb3   :  { %v307_v45 = vpop.f32.mrf.mxu3 }
  0xb4   :  { %v3193_v46 = vadd.f32 %v307_v45, %v127_v38 }
  0xb5   :  { %v3195_v47 = vpop.f32.mrf.mxu0  ;;  %v3199_v49 = vpop.f32.mrf.mxu2 }
  0xb7   :  { %v3197_v48 = vpop.f32.mrf.mxu1 }
  0xbb   :  { %v3201_v50 = vpop.f32.mrf.mxu3 }
  0xbd   :  { %v3203_v51 = vpop.f32.mrf.mxu0  ;;  %v3207_v54 = vpop.f32.mrf.mxu2 }
  0xbf   :  { %v345_v52 = vpop.f32.mrf.mxu1 }
  0xc0   :  { %v3205_v53 = vadd.f32 %v345_v52, %v127_v38 }
  0xc3   :  { %v3209_v55 = vpop.f32.mrf.mxu3 }
  0xc5   :  { %v3211_v56 = vpop.f32.mrf.mxu0  ;;  %v364_v58 = vpop.f32.mrf.mxu2 }
  0xc6   :  { %v3215_v59 = vadd.f32 %v364_v58, %v127_v38 }
  0xc7   :  { %v3213_v57 = vpop.f32.mrf.mxu1 }
  0xcb   :  { %v3217_v60 = vpop.f32.mrf.mxu3 }
  0xcd   :  { %v541_v61 = vpop.f32.mrf.mxu0 }
  0xce   :  { %v584_v7 = vadd.f32 %v541_v61, %v251_v3  ;;  %v277_v61 = vadd.f32 %v3197_v48, %v3232_v22 }
  0xcf   :  { %v3219_v62 = vpop.f32.mrf.mxu1 }
  0xd0   :  { %v592_v13 = vmul.f32 0.5, %v584_v7 }
  0xd2   :  { %2792 = vtanh.f32 %v592_v13 }
  0xd3   :  { %v383_v63 = vpop.f32.mrf.mxu3 }
  0xd4   :  { %v3221_v0 = vadd.f32 %v383_v63, %v127_v38 }
  0xd5   :  { %v543_v2 = vpop.f32.mrf.mxu0 }
  0xd6   :  { %v586_v9 = vadd.f32 %v543_v2, %v253_v5 }
  0xd7   :  { %v3223_v1 = vpop.f32.mrf.mxu1 }
  0xd8   :  { %v600_v14 = vmul.f32 0.5, %v586_v9  ;;  %v2793_v27 = vpop.eup %2792 }
  0xd9   :  { %v596_v35 = vmul.f32 0.5, %v2793_v27 }
  0xda   :  { %2794 = vtanh.f32 %v600_v14 }
  0xdb   :  { %v598_v45 = vadd.f32 0.5, %v596_v35 }
  0xdd   :  { %v546_v12 = vpop.f32.mrf.mxu0 }
  0xde   :  { %v588_v23 = vadd.f32 %v546_v12, %v256_v19 }
  0xdf   :  { %v563_v10 = vpop.f32.mrf.mxu1 }
  0xe0   :  { %v585_v11 = vadd.f32 %v563_v10, %v270_v6  ;;  %v2795_v28 = vpop.eup %2794  ;;  %v618_v6 = vmul.f32 0.0, %v598_v45 }
  0xe1   :  { %v604_v36 = vmul.f32 0.5, %v2795_v28 }
  0xe2   :  { %v593_v17 = vmul.f32 0.5, %v585_v11 }
  0xe3   :  { %v606_v52 = vadd.f32 0.5, %v604_v36  ;;  %v3788_v36 = vlaneseq }
  0xe4   :  { %2796 = vtanh.f32 %v593_v17 }
  0xe5   :  { %v548_v26 = vpop.f32.mrf.mxu0 }
  0xe6   :  { %v590_v31 = vadd.f32 %v548_v26, %v258_v24 }
  0xe7   :  { %v565_v20 = vpop.f32.mrf.mxu1 }
  0xe8   :  { %v587_v21 = vadd.f32 %v565_v20, %v272_v18  ;;  %v610_v38 = vmul.f32 0.5, %v590_v31 }
  0xea   :  { %v601_v25 = vmul.f32 0.5, %v587_v21  ;;  %v2797_v29 = vpop.eup %2796  ;;  %v3244_v21 = vld [vmem:[#allocation8 + $0x20] sm:$0xff] }
  0xeb   :  { %v597_v37 = vmul.f32 0.5, %v2797_v29  ;;  %v730_v26 = vunpack.c.l.bf16 %v3244_v21  ;;  %v731_v27 = vunpack.c.h.bf16 %v3244_v21 }
  0xec   :  { %2798 = vtanh.f32 %v601_v25 }
  0xed   :  { %2800 = vtanh.f32 %v588_v23  ;;  %v599_v58 = vadd.f32 0.5, %v597_v37  ;;  %v3261_v37 = vand.u32 127, %v3788_v36 }
  0xef   :  { %v568_v15 = vpop.f32.mrf.mxu1  ;;  %v619_v7 = vmul.f32 0.0, %v599_v58  ;;  %vm683_vm3 = vcmp.lt.s32.totalorder %v3261_v37, 111  ;;  %vm669_vm4 = vcmp.lt.s32.totalorder %v3261_v37, 113  ;;  %vm648_vm5 = vcmp.lt.s32.totalorder %v3261_v37, 15 }
  0xf0   :  { %v589_v34 = vadd.f32 %v568_v15, %v275_v30  ;;  %vm662_vm6 = vcmp.lt.s32.totalorder %v3261_v37, 127  ;;  %vm676_vm7 = vcmp.lt.s32.totalorder %v3261_v37, 112  ;;  %vm641_vm8 = vcmp.lt.s32.totalorder %v3261_v37, 16 }
  0xf1   :  { %vm634_vm9 = vcmp.lt.s32.totalorder %v3261_v37, 17  ;;  %vm655_vm10 = vcmp.lt.s32.totalorder %v3261_v37, 1  ;;  %vm1823_vm13 = vcmp.lt.s32.totalorder %v3261_v37, 126  ;;  %vm1860_vm14 = vcmp.lt.s32.totalorder %v3261_v37, 96 }
  0xf2   :  { %2802 = vtanh.f32 %v589_v34  ;;  %v2799_v39 = vpop.eup %2798 }
  0xf3   :  { %v2801_v16 = vpop.eup %2800  ;;  %v605_v41 = vmul.f32 0.5, %v2799_v39  ;;  %2804 = vtanh.f32 %v610_v38  ;;  %v703_v39 = vld [vmem:[#allocation8 + $0x40] sm:$0xff] }
  0xf4   :  { %v620_v42 = vmul.f32 %v2801_v16, %v606_v52  ;;  %v3268_v58 = vunpack.c.l.bf16 %v703_v39 }
  0xf5   :  { %v607_v63 = vadd.f32 0.5, %v605_v41 }
  0xf6   :  { %v3238_v11 = vadd.f32 %v620_v42, %v618_v6  ;;  %v3275_v6 = vld [vmem:[#allocation8 + $0x30] sm:$0xff] }
  0xf7   :  { %v570_v2 = vpop.f32.mrf.mxu1 }
  0xf8   :  { %v2803_v3 = vpop.eup %2802  ;;  %v591_v5 = vadd.f32 %v570_v2, %v277_v61  ;;  %v3270_v61 = vunpack.c.h.bf16 %v703_v39 }
  0xf9   :  { %v621_v9 = vmul.f32 %v2803_v3, %v607_v63  ;;  %v2805_v13 = vpop.eup %2804 }
  0xfa   :  { %v611_v10 = vmul.f32 0.5, %v591_v5  ;;  %v614_v14 = vmul.f32 0.5, %v2805_v13 }
  0xfb   :  { %v3240_v12 = vadd.f32 %v621_v9, %v619_v7 }
  0xfc   :  { %2806 = vtanh.f32 %v611_v10  ;;  %v616_v17 = vadd.f32 0.5, %v614_v14  ;;  %v734_v14 = vunpack.c.l.bf16 %v3275_v6 }
  0xfd   :  { %2808 = vtanh.f32 %v3238_v11 }
  0xfe   :  { %2810 = vtanh.f32 %v3240_v12 }
 0x102   :  { %v2807_v48 = vpop.eup %2806 }
 0x103   :  { %v615_v18 = vmul.f32 0.5, %v2807_v48  ;;  %v2809_v19 = vpop.eup %2808 }
 0x104   :  { %v2811_v23 = vpop.eup %2810  ;;  %v626_v24 = vmul.f32 %v2809_v19, %v616_v17 }
 0x105   :  { %v617_v20 = vadd.f32 0.5, %v615_v18  ;;  %v735_v18 = vunpack.c.h.bf16 %v3275_v6 }
 0x107   :  { %v627_v25 = vmul.f32 %v2811_v23, %v617_v20 }
 0x109   :  { %v690_v28 = vpack.c.bf16 %v627_v25, %v626_v24  ;;  %v2645_v29 = vpack.i.bf16 %v627_v25, %v626_v24 }
 0x10b   :  { %v712_v30 = vunpack.c.l.bf16 %v690_v28  ;;  %v713_v31 = vunpack.c.h.bf16 %v690_v28  ;;  %2646 = vrot.lane.b32.xlu1 %v2645_v29, %s3014_s19  ;;  %2641 = vrot.lane.b32.xlu0 %v2645_v29, %s3015_s20 }
 0x10c   :  { %2631 = vrot.lane.b32.xlu2 %v2645_v29, %s3016_s21 }
 0x10d   :  { %v748_v15 = vmul.f32 %v730_v26, %v712_v30  ;;  %v749_v34 = vmul.f32 %v731_v27, %v713_v31 }
 0x10f   :  { %v762_v35 = vpack.c.bf16 %v749_v34, %v748_v15 }
 0x111   :  { %771 = vst [vmem:[#allocation3 + $0x20] sm:$0xff] %v762_v35 }
 0x113   :  { %2661 = vrot.lane.b32.xlu1 %v2645_v29, %s3017_s22  ;;  %2656 = vrot.lane.b32.xlu0 %v2645_v29, %s3018_s23 }
 0x114   :  { %2636 = vrot.lane.b32.xlu2 %v2645_v29, %s3019_s24 }
 0x11c   :  { %2651 = vrot.lane.b32.xlu2 %v2645_v29, %s3020_s25 }
 0x124   :  { %2666 = vrot.lane.b32.xlu2 %v2645_v29, %s3021_s26 }
 0x166   :  { %v2632_v38 = vpop.permute.xlu2 %2631 }
 0x167   :  { %v2634_v16 = vunpack.i.h.bf16 %v2632_v38  ;;  %v2633_v41 = vunpack.i.l.bf16 %v2632_v38  ;;  %v3290_v38 = vld [vmem:[#allocation8 + $0x10] sm:$0xff] }
 0x169   :  { %v684_v45 = vsel %vm683_vm3, %v2633_v41, %v2634_v16  ;;  %v685_v52 = vsel %vm683_vm3, %v2634_v16, %v2633_v41 }
 0x16a   :  { %v694_v42 = vpack.c.bf16 %v685_v52, %v684_v45 }
 0x16c   :  { %v720_v63 = vunpack.c.l.bf16 %v694_v42  ;;  %v721_v2 = vunpack.c.h.bf16 %v694_v42  ;;  %v3792_v42 = vunpack.c.l.bf16 %v3290_v38 }
 0x16e   :  { %v756_v3 = vmul.f32 %v3268_v58, %v720_v63  ;;  %v757_v5 = vmul.f32 %v3270_v61, %v721_v2  ;;  %v2637_v7 = vpop.permute.xlu2 %2636  ;;  %v3789_v63 = vunpack.c.h.bf16 %v3290_v38 }
 0x16f   :  { %v2639_v9 = vunpack.i.h.bf16 %v2637_v7  ;;  %v2638_v10 = vunpack.i.l.bf16 %v2637_v7 }
 0x170   :  { %v766_v13 = vpack.c.bf16 %v757_v5, %v756_v3  ;;  %v700_v3 = vld [vmem:[#allocation8 + $0x28] sm:$0xff] }
 0x171   :  { %v670_v48 = vsel %vm669_vm4, %v2638_v10, %v2639_v9  ;;  %v671_v17 = vsel %vm669_vm4, %v2639_v9, %v2638_v10  ;;  %v3299_v9 = vunpack.c.l.bf16 %v700_v3  ;;  %v3301_v10 = vunpack.c.h.bf16 %v700_v3 }
 0x172   :  { %v692_v19 = vpack.c.bf16 %v671_v17, %v670_v48  ;;  %v810_v20 = vunpack.c.l.b16 %v766_v13  ;;  %v811_v23 = vunpack.c.h.b16 %v766_v13  ;;  %v702_v48 = vld [vmem:[#allocation8 + $0x38] sm:$0xff] }
 0x173   :  { %v3323_v3 = vunpack.c.h.bf16 %v702_v48 }
 0x174   :  { %v716_v24 = vunpack.c.l.bf16 %v692_v19  ;;  %v717_v25 = vunpack.c.h.bf16 %v692_v19  ;;  %v820_v28 = vpack.c.b16 %v810_v20, %v810_v20  ;;  %v821_v29 = vpack.c.b16 %v811_v23, %v811_v23 }
 0x176   :  { %v752_v30 = vmul.f32 %v734_v14, %v716_v24  ;;  %v753_v31 = vmul.f32 %v735_v18, %v717_v25  ;;  %v2652_v15 = vpop.permute.xlu2 %2651  ;;  %v831_v34 = vsel %vm525_vm1, %v820_v28, 0  ;;  %v834_v35 = vsel %vm525_vm1, %v821_v29, 0 }
 0x177   :  { %v2654_v39 = vunpack.i.h.bf16 %v2652_v15  ;;  %v2653_v16 = vunpack.i.l.bf16 %v2652_v15  ;;  %839 = vmatpush.bf16.msra.mxu2 %v831_v34  ;;  %862 = vmatpush.bf16.msrb.mxu3 %v834_v35 }
 0x178   :  { %v764_v41 = vpack.c.bf16 %v753_v31, %v752_v30  ;;  %v3309_v30 = vld [vmem:[#allocation8 + $0x8] sm:$0xff] }
 0x179   :  { %v649_v45 = vsel %vm648_vm5, %v2653_v16, %v2654_v39  ;;  %v650_v52 = vsel %vm648_vm5, %v2654_v39, %v2653_v16  ;;  %v3315_v16 = vunpack.c.l.bf16 %v702_v48 }
 0x17a   :  { %773 = vst [vmem:[#allocation3 + $0x30] sm:$0xff] %v764_v41  ;;  %v688_v2 = vpack.c.bf16 %v649_v45, %v650_v52 }
 0x17c   :  { %v708_v5 = vunpack.c.l.bf16 %v688_v2  ;;  %v709_v7 = vunpack.c.h.bf16 %v688_v2 }
 0x17d   :  { %v2647_v13 = vpop.permute.xlu1 %2646  ;;  %v2642_v17 = vpop.permute.xlu0 %2641 }
 0x17e   :  { %v744_v19 = vmul.f32 %v3792_v42, %v708_v5  ;;  %v745_v20 = vmul.f32 %v3789_v63, %v709_v7  ;;  %v2649_v23 = vunpack.i.h.bf16 %v2647_v13  ;;  %v2648_v24 = vunpack.i.l.bf16 %v2647_v13  ;;  %v2667_v25 = vpop.permute.xlu2 %2666 }
 0x17f   :  { %v2644_v28 = vunpack.i.h.bf16 %v2642_v17  ;;  %v2643_v29 = vunpack.i.l.bf16 %v2642_v17  ;;  %v2669_v31 = vunpack.i.h.bf16 %v2667_v25  ;;  %v2668_v15 = vunpack.i.l.bf16 %v2667_v25 }
 0x180   :  { %v760_v34 = vpack.c.bf16 %v745_v20, %v744_v19  ;;  %v663_v35 = vsel %vm662_vm6, %v2648_v24, %v2649_v23  ;;  %v664_v39 = vsel %vm662_vm6, %v2649_v23, %v2648_v24  ;;  %v3791_v7 = vunpack.c.l.bf16 %v3309_v30 }
 0x181   :  { %v691_v41 = vpack.c.bf16 %v664_v39, %v663_v35  ;;  %v677_v45 = vsel %vm676_vm7, %v2643_v29, %v2644_v28  ;;  %v678_v52 = vsel %vm676_vm7, %v2644_v28, %v2643_v29  ;;  %v642_v2 = vsel %vm641_vm8, %v2668_v15, %v2669_v31 }
 0x182   :  { %769 = vst [vmem:[#allocation3 + $0x10] sm:$0xff] %v760_v34  ;;  %v693_v5 = vpack.c.bf16 %v678_v52, %v677_v45  ;;  %v643_v13 = vsel %vm641_vm8, %v2669_v31, %v2668_v15  ;;  %v3790_v20 = vunpack.c.h.bf16 %v3309_v30 }
 0x183   :  { %v714_v17 = vunpack.c.l.bf16 %v691_v41  ;;  %v715_v19 = vunpack.c.h.bf16 %v691_v41  ;;  %v687_v23 = vpack.c.bf16 %v642_v2, %v643_v13  ;;  %v695_v41 = vld [vmem:[#allocation8] sm:$0xff] }
 0x184   :  { %v718_v24 = vunpack.c.l.bf16 %v693_v5  ;;  %v719_v25 = vunpack.c.h.bf16 %v693_v5 }
 0x185   :  { %v750_v48 = vmul.f32 %v3299_v9, %v714_v17  ;;  %v751_v28 = vmul.f32 %v3301_v10, %v715_v19  ;;  %v706_v29 = vunpack.c.l.bf16 %v687_v23  ;;  %v707_v34 = vunpack.c.h.bf16 %v687_v23  ;;  %v2662_v35 = vpop.permute.xlu1 %2661  ;;  %v2657_v39 = vpop.permute.xlu0 %2656  ;;  %v698_v17 = vld [vmem:[#allocation8 + $0x18] sm:$0xff] }
 0x186   :  { %v754_v31 = vmul.f32 %v3315_v16, %v718_v24  ;;  %v755_v15 = vmul.f32 %v3323_v3, %v719_v25  ;;  %v2664_v45 = vunpack.i.h.bf16 %v2662_v35  ;;  %v2663_v52 = vunpack.i.l.bf16 %v2662_v35 }
 0x187   :  { %v763_v2 = vpack.c.bf16 %v751_v28, %v750_v48  ;;  %v742_v5 = vmul.f32 %v3791_v7, %v706_v29  ;;  %v743_v13 = vmul.f32 %v3790_v20, %v707_v34  ;;  %v2659_v19 = vunpack.i.h.bf16 %v2657_v39  ;;  %v2298_v20 = vld [vmem:[#allocation3 + $0x30] sm:$0xf]  ;;  %v2554_v7 = vld [vmem:[#allocation3 + $0x34] sm:$0xf] }
 0x188   :  { %v765_v36 = vpack.c.bf16 %v755_v15, %v754_v31  ;;  %v635_v23 = vsel %vm634_vm9, %v2663_v52, %v2664_v45  ;;  %v636_v24 = vsel %vm634_vm9, %v2664_v45, %v2663_v52  ;;  %v2658_v25 = vunpack.i.l.bf16 %v2657_v39 }
 0x189   :  { %772 = vst [vmem:[#allocation3 + $0x28] sm:$0xff] %v763_v2  ;;  %v759_v63 = vpack.c.bf16 %v743_v13, %v742_v5  ;;  %v3343_v35 = vunpack.c.l.bf16 %v695_v41  ;;  %v3345_v48 = vunpack.c.h.bf16 %v695_v41  ;;  %v686_v28 = vpack.c.bf16 %v635_v23, %v636_v24 }
 0x18a   :  { %774 = vst [vmem:[#allocation3 + $0x38] sm:$0xff] %v765_v36  ;;  %v3347_v29 = vunpack.c.l.bf16 %v698_v17  ;;  %v656_v34 = vsel %vm655_vm10, %v2658_v25, %v2659_v19  ;;  %v657_v31 = vsel %vm655_vm10, %v2659_v19, %v2658_v25  ;;  %v3353_v39 = vunpack.c.h.bf16 %v698_v17 }
 0x18b   :  { %768 = vst [vmem:[#allocation3 + $0x8] sm:$0xff] %v759_v63  ;;  %v704_v15 = vunpack.c.l.bf16 %v686_v28  ;;  %v705_v45 = vunpack.c.h.bf16 %v686_v28  ;;  %v689_v52 = vpack.c.bf16 %v656_v34, %v657_v31 }
 0x18d   :  { %v740_v2 = vmul.f32 %v3343_v35, %v704_v15  ;;  %v741_v41 = vmul.f32 %v3345_v48, %v705_v45  ;;  %v710_v5 = vunpack.c.l.bf16 %v689_v52  ;;  %v711_v36 = vunpack.c.h.bf16 %v689_v52  ;;  %v2290_v15 = vld [vmem:[#allocation3 + $0x20] sm:$0xf]  ;;  %v2552_v45 = vld [vmem:[#allocation3 + $0x24] sm:$0xf] }
 0x18f   :  { %v758_v13 = vpack.c.bf16 %v741_v41, %v740_v2  ;;  %v746_v23 = vmul.f32 %v3347_v29, %v710_v5  ;;  %v747_v24 = vmul.f32 %v3353_v39, %v711_v36  ;;  %v2282_v41 = vld [vmem:[#allocation3 + $0x10] sm:$0xf]  ;;  %v2550_v36 = vld [vmem:[#allocation3 + $0x14] sm:$0xf] }
 0x190   :  { %v2553_v34 = vld [vmem:[#allocation3 + $0x24] sm:$0xf0]  ;;  %v2292_v31 = vld [vmem:[#allocation3 + $0x28] sm:$0xf0] }
 0x191   :  { %767 = vst [vmem:[#allocation3] sm:$0xff] %v758_v13  ;;  %v761_v63 = vpack.c.bf16 %v747_v24, %v746_v23  ;;  %v2555_v19 = vld [vmem:[#allocation3 + $0x34] sm:$0xf0]  ;;  %v2300_v25 = vld [vmem:[#allocation3 + $0x38] sm:$0xf0]  ;;  %v2291_v52 = vor.u32 %v2553_v34, %v2290_v15  ;;  %v2295_v2 = vor.u32 %v2552_v45, %v2292_v31 }
 0x192   :  { %v2299_v17 = vor.u32 %v2555_v19, %v2298_v20  ;;  %v2303_v28 = vor.u32 %v2554_v7, %v2300_v25  ;;  %v2549_v7 = vld [vmem:[#allocation3 + $0x4] sm:$0xf0] }
 0x193   :  { %770 = vst [vmem:[#allocation3 + $0x18] sm:$0xff] %v761_v63  ;;  %v2276_v63 = vld [vmem:[#allocation3 + $0x8] sm:$0xf0] }
 0x194   :  { %840 = vmatpush.bf16.msra.mxu2 %v2299_v17  ;;  %863 = vmatpush.bf16.msrb.mxu3 %v2303_v28  ;;  %v3367_v17 = vpop.f32.mrf.mxu2  ;;  %v3369_v28 = vpop.f32.mrf.mxu3 }
 0x198   :  { %841 = vmatpush.bf16.msra.mxu2 %v2291_v52  ;;  %864 = vmatpush.bf16.msrb.mxu3 %v2295_v2  ;;  %v2274_v42 = vld [vmem:[#allocation3] sm:$0xf]  ;;  %v2548_v20 = vld [vmem:[#allocation3 + $0x4] sm:$0xf] }
 0x199   :  { %v2275_v19 = vor.u32 %v2549_v7, %v2274_v42  ;;  %v2279_v25 = vor.u32 %v2548_v20, %v2276_v63 }
 0x19a   :  { %v2551_v5 = vld [vmem:[#allocation3 + $0x14] sm:$0xf0]  ;;  %v2284_v13 = vld [vmem:[#allocation3 + $0x18] sm:$0xf0] }
 0x19b   :  { %v2283_v23 = vor.u32 %v2551_v5, %v2282_v41  ;;  %v2287_v24 = vor.u32 %v2550_v36, %v2284_v13  ;;  %v291_v5 = vadd.f32 %v3191_v44, %v3225_v4  ;;  %v310_v36 = vadd.f32 %v3201_v50, %v3225_v4 }
 0x19c   :  { %v3371_v42 = vpop.f32.mrf.mxu2  ;;  %v3373_v34 = vpop.f32.mrf.mxu3  ;;  %v313_v44 = vadd.f32 %v3209_v55, %v3228_v8  ;;  %v315_v55 = vadd.f32 %v3217_v60, %v3232_v22 }
 0x19d   :  { %842 = vmatpush.bf16.msra.mxu2 %v2283_v23  ;;  %865 = vmatpush.bf16.msrb.mxu3 %v2287_v24 }
 0x1a1   :  { %843 = vmatpush.bf16.msra.mxu2 %v2275_v19  ;;  %866 = vmatpush.bf16.msrb.mxu3 %v2279_v25 }
 0x1a4   :  { %2304 = vmatmul.msk.bf16.vlgmr.msra.gmra.mxu2 %vm515_vm2, %v3164_v32  ;;  %2307 = vmatmul.msk.bf16.vlgmr.msrb.gmra.mxu3 %vm515_vm2, %v3164_v32  ;;  %v3375_v31 = vpop.f32.mrf.mxu2  ;;  %v3377_v15 = vpop.f32.mrf.mxu3 }
 0x1b4   :  { %2305 = vmatmul.msk.bf16.gmra.mxu2 %vm515_vm2, %v3177_v33  ;;  %2308 = vmatmul.msk.bf16.gmra.mxu3 %vm515_vm2, %v3177_v33 }
 0x227   :  { %v845_v45 = vpop.f32.mrf.mxu2  ;;  %v868_v32 = vpop.f32.mrf.mxu3 }
 0x228   :  { %v901_v52 = vadd.f32 %v845_v45, %v3187_v40  ;;  %v902_v2 = vadd.f32 %v868_v32, %v3193_v46  ;;  %v294_v46 = vadd.f32 %v3199_v49, %v3228_v8  ;;  %v296_v49 = vadd.f32 %v3207_v54, %v3232_v22 }
 0x22a   :  { %v909_v41 = vmul.f32 0.5, %v901_v52  ;;  %v910_v33 = vmul.f32 0.5, %v902_v2 }
 0x22c   :  { %2812 = vtanh.f32 %v909_v41 }
 0x22d   :  { %2814 = vtanh.f32 %v910_v33 }
 0x22f   :  { %v847_v13 = vpop.f32.mrf.mxu2  ;;  %v870_v23 = vpop.f32.mrf.mxu3 }
 0x230   :  { %v903_v24 = vadd.f32 %v847_v13, %v291_v5  ;;  %v904_v20 = vadd.f32 %v870_v23, %v310_v36 }
 0x232   :  { %v917_v7 = vmul.f32 0.5, %v903_v24  ;;  %v918_v63 = vmul.f32 0.5, %v904_v20  ;;  %v2813_v40 = vpop.eup %2812 }
 0x233   :  { %v2815_v19 = vpop.eup %2814  ;;  %v913_v52 = vmul.f32 0.5, %v2813_v40 }
 0x234   :  { %2816 = vtanh.f32 %v917_v7  ;;  %v914_v41 = vmul.f32 0.5, %v2815_v19 }
 0x235   :  { %2818 = vtanh.f32 %v918_v63  ;;  %v915_v13 = vadd.f32 0.5, %v913_v52 }
 0x236   :  { %v916_v23 = vadd.f32 0.5, %v914_v41 }
 0x237   :  { %v850_v25 = vpop.f32.mrf.mxu2  ;;  %v873_v50 = vpop.f32.mrf.mxu3 }
 0x238   :  { %v905_v45 = vadd.f32 %v850_v25, %v294_v46  ;;  %v906_v32 = vadd.f32 %v873_v50, %v313_v44  ;;  %v935_v25 = vmul.f32 %v915_v13, %v3238_v11 }
 0x23a   :  { %v2817_v2 = vpop.eup %2816  ;;  %2820 = vtanh.f32 %v905_v45  ;;  %v936_v45 = vmul.f32 %v916_v23, %v3240_v12 }
 0x23b   :  { %v2819_v33 = vpop.eup %2818  ;;  %v921_v5 = vmul.f32 0.5, %v2817_v2  ;;  %2822 = vtanh.f32 %v906_v32 }
 0x23c   :  { %v922_v36 = vmul.f32 0.5, %v2819_v33 }
 0x23d   :  { %v923_v24 = vadd.f32 0.5, %v921_v5 }
 0x23e   :  { %v924_v40 = vadd.f32 0.5, %v922_v36 }
 0x23f   :  { %v852_v20 = vpop.f32.mrf.mxu2  ;;  %v875_v7 = vpop.f32.mrf.mxu3 }
 0x240   :  { %v2821_v63 = vpop.eup %2820  ;;  %v907_v46 = vadd.f32 %v852_v20, %v296_v49  ;;  %v908_v44 = vadd.f32 %v875_v7, %v315_v55 }
 0x241   :  { %v2823_v19 = vpop.eup %2822  ;;  %v937_v50 = vmul.f32 %v2821_v63, %v923_v24 }
 0x242   :  { %v938_v32 = vmul.f32 %v2823_v19, %v924_v40  ;;  %v927_v52 = vmul.f32 0.5, %v907_v46  ;;  %v928_v2 = vmul.f32 0.5, %v908_v44 }
 0x243   :  { %v3395_v54 = vadd.f32 %v937_v50, %v935_v25 }
 0x244   :  { %v3397_v60 = vadd.f32 %v938_v32, %v936_v45  ;;  %2824 = vtanh.f32 %v927_v52  ;;  %v447_v52 = vld [vmem:[%s3781_s4 + $0x10] sm:$0xf] }
 0x245   :  { %2826 = vtanh.f32 %v928_v2  ;;  %v466_v2 = vunpack.c.l.b16 %v447_v52 }
 0x246   :  { %2828 = vtanh.f32 %v3395_v54 }
 0x247   :  { %2830 = vtanh.f32 %v3397_v60 }
 0x24a   :  { %v2825_v41 = vpop.eup %2824 }
 0x24b   :  { %v931_v33 = vmul.f32 0.5, %v2825_v41  ;;  %v2827_v5 = vpop.eup %2826 }
 0x24c   :  { %v932_v36 = vmul.f32 0.5, %v2827_v5  ;;  %v2829_v13 = vpop.eup %2828 }
 0x24d   :  { %v933_v11 = vadd.f32 0.5, %v931_v33  ;;  %v2831_v55 = vpop.eup %2830 }
 0x24e   :  { %v934_v49 = vadd.f32 0.5, %v932_v36 }
 0x24f   :  { %v943_v12 = vmul.f32 %v2829_v13, %v933_v11  ;;  %v3422_v13 = vpack.c.b16 %v466_v2, %v466_v2 }
 0x250   :  { %v944_v23 = vmul.f32 %v2831_v55, %v934_v49 }
 0x251   :  { %2268 = vmatmul.msk.bf16.gmra.mxu0 %vm515_vm2, %v3422_v13  ;;  %2271 = vmatmul.msk.bf16.gmra.mxu1 %vm515_vm2, %v3422_v13 }
 0x252   :  { %v997_v24 = vpack.c.bf16 %v944_v23, %v943_v12  ;;  %v2680_v20 = vpack.i.bf16 %v944_v23, %v943_v12  ;;  %2306 = vmatmul.msk.bf16.gmra.mxu2 %vm515_vm2, %v3422_v13  ;;  %2309 = vmatmul.msk.bf16.gmra.mxu3 %vm515_vm2, %v3422_v13 }
 0x254   :  { %v1019_v7 = vunpack.c.l.bf16 %v997_v24  ;;  %v1020_v63 = vunpack.c.h.bf16 %v997_v24  ;;  %2681 = vrot.lane.b32.xlu2 %v2680_v20, %s3015_s20  ;;  %2676 = vrot.lane.b32.xlu1 %v2680_v20, %s3019_s24 }
 0x255   :  { %2671 = vrot.lane.b32.xlu0 %v2680_v20, %s3016_s21 }
 0x256   :  { %v1055_v40 = vmul.f32 %v1019_v7, %v730_v26  ;;  %v1056_v46 = vmul.f32 %v1020_v63, %v731_v27 }
 0x258   :  { %v1069_v44 = vpack.c.bf16 %v1056_v46, %v1055_v40 }
 0x25a   :  { %1078 = vst [vmem:[#allocation3 + $0x20] sm:$0xff] %v1069_v44 }
 0x25c   :  { %2696 = vrot.lane.b32.xlu2 %v2680_v20, %s3018_s23  ;;  %2691 = vrot.lane.b32.xlu1 %v2680_v20, %s3020_s25 }
 0x25d   :  { %2686 = vrot.lane.b32.xlu0 %v2680_v20, %s3014_s19 }
 0x264   :  { %2706 = vrot.lane.b32.xlu1 %v2680_v20, %s3021_s26 }
 0x265   :  { %2701 = vrot.lane.b32.xlu0 %v2680_v20, %s3017_s22 }
 0x2ae   :  { %v2682_v19 = vpop.permute.xlu2 %2681 }
 0x2af   :  { %v2684_v25 = vunpack.i.h.bf16 %v2682_v19  ;;  %v2683_v50 = vunpack.i.l.bf16 %v2682_v19 }
 0x2b1   :  { %v985_v26 = vsel %vm676_vm7, %v2683_v50, %v2684_v25  ;;  %v986_v21 = vsel %vm676_vm7, %v2684_v25, %v2683_v50 }
 0x2b2   :  { %v1000_v27 = vpack.c.bf16 %v986_v21, %v985_v26 }
 0x2b4   :  { %v1025_v45 = vunpack.c.l.bf16 %v1000_v27  ;;  %v1026_v32 = vunpack.c.h.bf16 %v1000_v27 }
 0x2b6   :  { %v1061_v41 = vmul.f32 %v1025_v45, %v3315_v16  ;;  %v1062_v33 = vmul.f32 %v1026_v32, %v3323_v3  ;;  %v2697_v5 = vpop.permute.xlu2 %2696 }
 0x2b7   :  { %v2699_v11 = vunpack.i.h.bf16 %v2697_v5  ;;  %v2698_v36 = vunpack.i.l.bf16 %v2697_v5 }
 0x2b8   :  { %v1072_v12 = vpack.c.bf16 %v1062_v33, %v1061_v41 }
 0x2b9   :  { %v967_v49 = vsel %vm655_vm10, %v2698_v36, %v2699_v11  ;;  %v968_v55 = vsel %vm655_vm10, %v2699_v11, %v2698_v36 }
 0x2ba   :  { %1081 = vst [vmem:[#allocation3 + $0x38] sm:$0xff] %v1072_v12  ;;  %v996_v23 = vpack.c.bf16 %v967_v49, %v968_v55 }
 0x2bc   :  { %v1017_v24 = vunpack.c.l.bf16 %v996_v23  ;;  %v1018_v20 = vunpack.c.h.bf16 %v996_v23 }
 0x2be   :  { %v1053_v7 = vmul.f32 %v1017_v24, %v3347_v29  ;;  %v1054_v63 = vmul.f32 %v1018_v20, %v3353_v39 }
 0x2c0   :  { %v1068_v40 = vpack.c.bf16 %v1054_v63, %v1053_v7 }
 0x2c2   :  { %1077 = vst [vmem:[#allocation3 + $0x18] sm:$0xff] %v1068_v40 }
 0x2c6   :  { %v2677_v46 = vpop.permute.xlu1 %2676 }
 0x2c7   :  { %v2679_v44 = vunpack.i.h.bf16 %v2677_v46  ;;  %v2678_v19 = vunpack.i.l.bf16 %v2677_v46  ;;  %v2672_v25 = vpop.permute.xlu0 %2671 }
 0x2c8   :  { %v2674_v50 = vunpack.i.h.bf16 %v2672_v25  ;;  %v2673_v26 = vunpack.i.l.bf16 %v2672_v25 }
 0x2c9   :  { %v979_v21 = vsel %vm669_vm4, %v2678_v19, %v2679_v44  ;;  %v980_v27 = vsel %vm669_vm4, %v2679_v44, %v2678_v19 }
 0x2ca   :  { %v999_v45 = vpack.c.bf16 %v980_v27, %v979_v21  ;;  %v991_v32 = vsel %vm683_vm3, %v2673_v26, %v2674_v50  ;;  %v992_v52 = vsel %vm683_vm3, %v2674_v50, %v2673_v26 }
 0x2cb   :  { %v1001_v2 = vpack.c.bf16 %v992_v52, %v991_v32 }
 0x2cc   :  { %v1023_v41 = vunpack.c.l.bf16 %v999_v45  ;;  %v1024_v33 = vunpack.c.h.bf16 %v999_v45 }
 0x2cd   :  { %v1027_v5 = vunpack.c.l.bf16 %v1001_v2  ;;  %v1028_v11 = vunpack.c.h.bf16 %v1001_v2 }
 0x2ce   :  { %v1059_v36 = vmul.f32 %v1023_v41, %v734_v14  ;;  %v1060_v12 = vmul.f32 %v1024_v33, %v735_v18  ;;  %v2692_v49 = vpop.permute.xlu1 %2691  ;;  %v3793_v33 = vunpack.c.l.bf16 %v3290_v38 }
 0x2cf   :  { %v1063_v55 = vmul.f32 %v1027_v5, %v3268_v58  ;;  %v1064_v23 = vmul.f32 %v1028_v11, %v3270_v61  ;;  %v2694_v24 = vunpack.i.h.bf16 %v2692_v49  ;;  %v2693_v20 = vunpack.i.l.bf16 %v2692_v49  ;;  %v2687_v7 = vpop.permute.xlu0 %2686 }
 0x2d0   :  { %v1071_v63 = vpack.c.bf16 %v1060_v12, %v1059_v36  ;;  %v2689_v40 = vunpack.i.h.bf16 %v2687_v7  ;;  %v2688_v46 = vunpack.i.l.bf16 %v2687_v7  ;;  %v3794_v11 = vunpack.c.h.bf16 %v3290_v38 }
 0x2d1   :  { %v1073_v44 = vpack.c.bf16 %v1064_v23, %v1063_v55  ;;  %v961_v19 = vsel %vm648_vm5, %v2693_v20, %v2694_v24  ;;  %v962_v14 = vsel %vm648_vm5, %v2694_v24, %v2693_v20 }
 0x2d2   :  { %1080 = vst [vmem:[#allocation3 + $0x30] sm:$0xff] %v1071_v63  ;;  %v995_v6 = vpack.c.bf16 %v961_v19, %v962_v14  ;;  %v973_v18 = vsel %vm662_vm6, %v2688_v46, %v2689_v40  ;;  %v974_v25 = vsel %vm662_vm6, %v2689_v40, %v2688_v46 }
 0x2d3   :  { %v998_v50 = vpack.c.bf16 %v974_v25, %v973_v18  ;;  %v1117_v26 = vunpack.c.l.b16 %v1073_v44  ;;  %v1118_v21 = vunpack.c.h.b16 %v1073_v44 }
 0x2d4   :  { %v1015_v27 = vunpack.c.l.bf16 %v995_v6  ;;  %v1016_v45 = vunpack.c.h.bf16 %v995_v6 }
 0x2d5   :  { %v1021_v32 = vunpack.c.l.bf16 %v998_v50  ;;  %v1022_v52 = vunpack.c.h.bf16 %v998_v50  ;;  %v1127_v2 = vpack.c.b16 %v1117_v26, %v1117_v26  ;;  %v1128_v41 = vpack.c.b16 %v1118_v21, %v1118_v21  ;;  %v2563_v21 = vld [vmem:[#allocation3 + $0x34] sm:$0xf0] }
 0x2d6   :  { %v1051_v5 = vmul.f32 %v1015_v27, %v3793_v33  ;;  %v1052_v36 = vmul.f32 %v1016_v45, %v3794_v11  ;;  %v2707_v12 = vpop.permute.xlu1 %2706  ;;  %v2338_v27 = vld [vmem:[#allocation3 + $0x38] sm:$0xf0]  ;;  %v3795_v11 = vunpack.c.l.bf16 %v3309_v30 }
 0x2d7   :  { %v1057_v49 = vmul.f32 %v1021_v32, %v3299_v9  ;;  %v1058_v55 = vmul.f32 %v1022_v52, %v3301_v10  ;;  %v2709_v23 = vunpack.i.h.bf16 %v2707_v12  ;;  %v2708_v24 = vunpack.i.l.bf16 %v2707_v12  ;;  %v2702_v20 = vpop.permute.xlu0 %2701 }
 0x2d8   :  { %v1067_v7 = vpack.c.bf16 %v1052_v36, %v1051_v5  ;;  %v2704_v63 = vunpack.i.h.bf16 %v2702_v20  ;;  %v2703_v40 = vunpack.i.l.bf16 %v2702_v20  ;;  %v1138_v46 = vsel %vm525_vm1, %v1127_v2, 0 }
 0x2d9   :  { %v1070_v44 = vpack.c.bf16 %v1058_v55, %v1057_v49  ;;  %v955_v19 = vsel %vm641_vm8, %v2708_v24, %v2709_v23  ;;  %v956_v38 = vsel %vm641_vm8, %v2709_v23, %v2708_v24  ;;  %1146 = vmatpush.bf16.msrb.mxu0 %v1138_v46  ;;  %v1141_v14 = vsel %vm525_vm1, %v1128_v41, 0  ;;  %v2336_v6 = vld [vmem:[#allocation3 + $0x30] sm:$0xf]  ;;  %v2562_v18 = vld [vmem:[#allocation3 + $0x34] sm:$0xf] }
 0x2da   :  { %1076 = vst [vmem:[#allocation3 + $0x10] sm:$0xff] %v1067_v7  ;;  %v994_v25 = vpack.c.bf16 %v955_v19, %v956_v38  ;;  %v949_v50 = vsel %vm634_vm9, %v2703_v40, %v2704_v63  ;;  %v950_v26 = vsel %vm634_vm9, %v2704_v63, %v2703_v40  ;;  %1169 = vmatpush.bf16.msrb.mxu1 %v1141_v14  ;;  %v3796_v12 = vunpack.c.h.bf16 %v3309_v30  ;;  %v2328_v7 = vld [vmem:[#allocation3 + $0x20] sm:$0xf]  ;;  %v2560_v63 = vld [vmem:[#allocation3 + $0x24] sm:$0xf] }
 0x2db   :  { %1079 = vst [vmem:[#allocation3 + $0x28] sm:$0xff] %v1070_v44  ;;  %v993_v45 = vpack.c.bf16 %v949_v50, %v950_v26  ;;  %v2337_v32 = vor.u32 %v2563_v21, %v2336_v6  ;;  %v2341_v52 = vor.u32 %v2562_v18, %v2338_v27  ;;  %v2559_v30 = vld [vmem:[#allocation3 + $0x14] sm:$0xf0]  ;;  %v2322_v6 = vld [vmem:[#allocation3 + $0x18] sm:$0xf0] }
 0x2dc   :  { %v1013_v2 = vunpack.c.l.bf16 %v994_v25  ;;  %v1014_v33 = vunpack.c.h.bf16 %v994_v25 }
 0x2dd   :  { %v1011_v41 = vunpack.c.l.bf16 %v993_v45  ;;  %v1012_v5 = vunpack.c.h.bf16 %v993_v45  ;;  %1147 = vmatpush.bf16.msrb.mxu0 %v2337_v32 }
 0x2de   :  { %v1049_v36 = vmul.f32 %v1013_v2, %v3795_v11  ;;  %v1050_v49 = vmul.f32 %v1014_v33, %v3796_v12  ;;  %1170 = vmatpush.bf16.msrb.mxu1 %v2341_v52  ;;  %v3485_v52 = vld [vmem:[%s3781_s4] sm:$0xff]  ;;  %v3494_v2 = vld [vmem:[%s3781_s4 + $0x8] sm:$0xff]  ;;  %v551_v33 = vpop.f32.mrf.mxu0 }
 0x2df   :  { %v1047_v55 = vmul.f32 %v1011_v41, %v3343_v35  ;;  %v1048_v23 = vmul.f32 %v1012_v5, %v3345_v48  ;;  %v573_v41 = vpop.f32.mrf.mxu1 }
 0x2e0   :  { %v1066_v24 = vpack.c.bf16 %v1050_v49, %v1049_v36 }
 0x2e1   :  { %v1065_v20 = vpack.c.bf16 %v1048_v23, %v1047_v55  ;;  %v2320_v38 = vld [vmem:[#allocation3 + $0x10] sm:$0xf]  ;;  %v2558_v14 = vld [vmem:[#allocation3 + $0x14] sm:$0xf] }
 0x2e2   :  { %1075 = vst [vmem:[#allocation3 + $0x8] sm:$0xff] %v1066_v24  ;;  %v2561_v40 = vld [vmem:[#allocation3 + $0x24] sm:$0xf0]  ;;  %v2330_v46 = vld [vmem:[#allocation3 + $0x28] sm:$0xf0]  ;;  %v2321_v18 = vor.u32 %v2559_v30, %v2320_v38  ;;  %v2325_v25 = vor.u32 %v2558_v14, %v2322_v6 }
 0x2e3   :  { %1074 = vst [vmem:[#allocation3] sm:$0xff] %v1065_v20  ;;  %v2329_v44 = vor.u32 %v2561_v40, %v2328_v7  ;;  %v2333_v19 = vor.u32 %v2560_v63, %v2330_v46  ;;  %v329_v20 = vadd.f32 %v3195_v47, %v3225_v4  ;;  %v348_v7 = vadd.f32 %v3213_v57, %v3225_v4 }
 0x2e4   :  { %v351_v47 = vadd.f32 %v3219_v62, %v3228_v8  ;;  %v353_v62 = vadd.f32 %v3223_v1, %v3232_v22 }
 0x2e5   :  { %1148 = vmatpush.bf16.msrb.mxu0 %v2329_v44  ;;  %1171 = vmatpush.bf16.msrb.mxu1 %v2333_v19 }
 0x2e6   :  { %v552_v5 = vpop.f32.mrf.mxu0 }
 0x2e7   :  { %v574_v11 = vpop.f32.mrf.mxu1 }
 0x2e9   :  { %1149 = vmatpush.bf16.msrb.mxu0 %v2321_v18  ;;  %1172 = vmatpush.bf16.msrb.mxu1 %v2325_v25  ;;  %v2557_v50 = vld [vmem:[#allocation3 + $0x4] sm:$0xf0]  ;;  %v2314_v26 = vld [vmem:[#allocation3 + $0x8] sm:$0xf0] }
 0x2ea   :  { %v2312_v21 = vld [vmem:[#allocation3] sm:$0xf]  ;;  %v2556_v27 = vld [vmem:[#allocation3 + $0x4] sm:$0xf] }
 0x2eb   :  { %v2313_v45 = vor.u32 %v2557_v50, %v2312_v21  ;;  %v2317_v32 = vor.u32 %v2556_v27, %v2314_v26 }
 0x2ed   :  { %1150 = vmatpush.bf16.msrb.mxu0 %v2313_v45  ;;  %1173 = vmatpush.bf16.msrb.mxu1 %v2317_v32 }
 0x2f0   :  { %2342 = vmatmul.msk.bf16.vlgmr.msrb.gmra.mxu0 %vm515_vm2, %v3485_v52  ;;  %2345 = vmatmul.msk.bf16.vlgmr.msrb.gmra.mxu1 %vm515_vm2, %v3485_v52 }
 0x300   :  { %2343 = vmatmul.msk.bf16.gmra.mxu0 %vm515_vm2, %v3494_v2  ;;  %2346 = vmatmul.msk.bf16.gmra.mxu1 %vm515_vm2, %v3494_v2 }
 0x310   :  { %2347 = vmatmul.msk.bf16.gmra.mxu1 %vm515_vm2, %v3422_v13  ;;  %2344 = vmatmul.msk.bf16.gmra.mxu0 %vm515_vm2, %v3422_v13 }
 0x36d   :  { %v1152_v36 = vpop.f32.mrf.mxu0  ;;  %v1175_v12 = vpop.f32.mrf.mxu1 }
 0x36e   :  { %v1204_v49 = vadd.f32 %v1152_v36, %v3189_v43  ;;  %v1205_v55 = vadd.f32 %v1175_v12, %v3205_v53  ;;  %v332_v53 = vadd.f32 %v3203_v51, %v3228_v8  ;;  %v334_v51 = vadd.f32 %v3211_v56, %v3232_v22 }
 0x370   :  { %v1212_v23 = vmul.f32 0.5, %v1204_v49  ;;  %v1213_v24 = vmul.f32 0.5, %v1205_v55 }
 0x372   :  { %2832 = vtanh.f32 %v1212_v23 }
 0x373   :  { %2834 = vtanh.f32 %v1213_v24 }
 0x375   :  { %v1154_v63 = vpop.f32.mrf.mxu0  ;;  %v1177_v40 = vpop.f32.mrf.mxu1 }
 0x376   :  { %v1206_v46 = vadd.f32 %v1154_v63, %v329_v20  ;;  %v1207_v44 = vadd.f32 %v1177_v40, %v348_v7 }
 0x378   :  { %v1220_v19 = vmul.f32 0.5, %v1206_v46  ;;  %v1221_v38 = vmul.f32 0.5, %v1207_v44  ;;  %v2833_v43 = vpop.eup %2832 }
 0x379   :  { %v2835_v14 = vpop.eup %2834  ;;  %v1216_v25 = vmul.f32 0.5, %v2833_v43 }
 0x37a   :  { %2836 = vtanh.f32 %v1220_v19  ;;  %v1217_v26 = vmul.f32 0.5, %v2835_v14  ;;  %v3526_v14 = vld [vmem:[#allocation8 + $0x20] sm:$0xff] }
 0x37b   :  { %2838 = vtanh.f32 %v1221_v38  ;;  %v1218_v32 = vadd.f32 0.5, %v1216_v25 }
 0x37c   :  { %v1219_v33 = vadd.f32 0.5, %v1217_v26 }
 0x37d   :  { %v1157_v30 = vpop.f32.mrf.mxu0  ;;  %v1180_v57 = vpop.f32.mrf.mxu1  ;;  %v1238_v24 = vmul.f32 %v1218_v32, %v3395_v54 }
 0x37e   :  { %v1208_v6 = vadd.f32 %v1157_v30, %v332_v53  ;;  %v1209_v18 = vadd.f32 %v1180_v57, %v351_v47  ;;  %v1239_v7 = vmul.f32 %v1219_v33, %v3397_v60 }
 0x380   :  { %v2837_v50 = vpop.eup %2836  ;;  %2840 = vtanh.f32 %v1208_v6  ;;  %v1340_v6 = vunpack.c.l.bf16 %v3526_v14 }
 0x381   :  { %v2839_v21 = vpop.eup %2838  ;;  %v1224_v27 = vmul.f32 0.5, %v2837_v50  ;;  %2842 = vtanh.f32 %v1209_v18  ;;  %v1341_v18 = vunpack.c.h.bf16 %v3526_v14 }
 0x382   :  { %v1225_v45 = vmul.f32 0.5, %v2839_v21 }
 0x383   :  { %v1226_v41 = vadd.f32 0.5, %v1224_v27 }
 0x384   :  { %v1227_v12 = vadd.f32 0.5, %v1225_v45 }
 0x385   :  { %v1159_v5 = vpop.f32.mrf.mxu0  ;;  %v1182_v11 = vpop.f32.mrf.mxu1 }
 0x386   :  { %v2841_v36 = vpop.eup %2840  ;;  %v1210_v49 = vadd.f32 %v1159_v5, %v334_v51  ;;  %v1211_v55 = vadd.f32 %v1182_v11, %v353_v62 }
 0x387   :  { %v2843_v23 = vpop.eup %2842  ;;  %v1240_v20 = vmul.f32 %v2841_v36, %v1226_v41 }
 0x388   :  { %v1241_v63 = vmul.f32 %v2843_v23, %v1227_v12  ;;  %v1230_v40 = vmul.f32 0.5, %v1210_v49  ;;  %v1231_v46 = vmul.f32 0.5, %v1211_v55 }
 0x389   :  { %v3520_v56 = vadd.f32 %v1240_v20, %v1238_v24 }
 0x38a   :  { %v3522_v1 = vadd.f32 %v1241_v63, %v1239_v7  ;;  %2844 = vtanh.f32 %v1230_v40 }
 0x38b   :  { %2846 = vtanh.f32 %v1231_v46 }
 0x38c   :  { %2848 = vtanh.f32 %v3520_v56 }
 0x38d   :  { %2850 = vtanh.f32 %v3522_v1 }
 0x390   :  { %v2845_v44 = vpop.eup %2844 }
 0x391   :  { %v1234_v19 = vmul.f32 0.5, %v2845_v44  ;;  %v2847_v38 = vpop.eup %2846 }
 0x392   :  { %v1235_v43 = vmul.f32 0.5, %v2847_v38  ;;  %v2849_v53 = vpop.eup %2848 }
 0x393   :  { %v1236_v54 = vadd.f32 0.5, %v1234_v19  ;;  %v2851_v30 = vpop.eup %2850 }
 0x394   :  { %v1237_v47 = vadd.f32 0.5, %v1235_v43 }
 0x395   :  { %v1246_v60 = vmul.f32 %v2849_v53, %v1236_v54 }
 0x396   :  { %v1247_v57 = vmul.f32 %v2851_v30, %v1237_v47 }
 0x398   :  { %v1300_v25 = vpack.c.bf16 %v1247_v57, %v1246_v60  ;;  %v2720_v50 = vpack.i.bf16 %v1247_v57, %v1246_v60 }
 0x39a   :  { %v1322_v26 = vunpack.c.l.bf16 %v1300_v25  ;;  %v1323_v21 = vunpack.c.h.bf16 %v1300_v25  ;;  %2721 = vrot.lane.b32.xlu1 %v2720_v50, %s3015_s20  ;;  %2716 = vrot.lane.b32.xlu0 %v2720_v50, %s3019_s24 }
 0x39b   :  { %2711 = vrot.lane.b32.xlu2 %v2720_v50, %s3016_s21 }
 0x39c   :  { %v1358_v27 = vmul.f32 %v1340_v6, %v1322_v26  ;;  %v1359_v45 = vmul.f32 %v1341_v18, %v1323_v21 }
 0x39e   :  { %v1372_v32 = vpack.c.bf16 %v1359_v45, %v1358_v27 }
 0x3a0   :  { %1381 = vst [vmem:[#allocation3 + $0x20] sm:$0xff] %v1372_v32 }
 0x3a2   :  { %2736 = vrot.lane.b32.xlu1 %v2720_v50, %s3018_s23  ;;  %2731 = vrot.lane.b32.xlu0 %v2720_v50, %s3020_s25 }
 0x3a3   :  { %2726 = vrot.lane.b32.xlu2 %v2720_v50, %s3014_s19 }
 0x3aa   :  { %2746 = vrot.lane.b32.xlu0 %v2720_v50, %s3021_s26 }
 0x3ab   :  { %2741 = vrot.lane.b32.xlu2 %v2720_v50, %s3017_s22 }
 0x3f5   :  { %v2712_v51 = vpop.permute.xlu2 %2711 }
 0x3f6   :  { %v2714_v62 = vunpack.i.h.bf16 %v2712_v51  ;;  %v2713_v33 = vunpack.i.l.bf16 %v2712_v51 }
 0x3f8   :  { %v1294_v41 = vsel %vm683_vm3, %v2713_v33, %v2714_v62  ;;  %v1295_v5 = vsel %vm683_vm3, %v2714_v62, %v2713_v33 }
 0x3f9   :  { %v1304_v11 = vpack.c.bf16 %v1295_v5, %v1294_v41  ;;  %v3562_v5 = vld [vmem:[#allocation8 + $0x30] sm:$0xff] }
 0x3fb   :  { %v1330_v36 = vunpack.c.l.bf16 %v1304_v11  ;;  %v1331_v12 = vunpack.c.h.bf16 %v1304_v11 }
 0x3fd   :  { %v1366_v49 = vmul.f32 %v1330_v36, %v3268_v58  ;;  %v1367_v55 = vmul.f32 %v1331_v12, %v3270_v61  ;;  %v2727_v23 = vpop.permute.xlu2 %2726 }
 0x3fe   :  { %v2729_v24 = vunpack.i.h.bf16 %v2727_v23  ;;  %v2728_v20 = vunpack.i.l.bf16 %v2727_v23 }
 0x3ff   :  { %v1376_v7 = vpack.c.bf16 %v1367_v55, %v1366_v49 }
 0x400   :  { %v1276_v63 = vsel %vm662_vm6, %v2728_v20, %v2729_v24  ;;  %v1277_v40 = vsel %vm662_vm6, %v2729_v24, %v2728_v20  ;;  %v1345_v20 = vunpack.c.h.bf16 %v3562_v5 }
 0x401   :  { %v1301_v46 = vpack.c.bf16 %v1277_v40, %v1276_v63  ;;  %v1420_v44 = vunpack.c.l.b16 %v1376_v7  ;;  %v1421_v19 = vunpack.c.h.b16 %v1376_v7 }
 0x403   :  { %v1324_v38 = vunpack.c.l.bf16 %v1301_v46  ;;  %v1325_v54 = vunpack.c.h.bf16 %v1301_v46  ;;  %v1430_v43 = vpack.c.b16 %v1420_v44, %v1420_v44  ;;  %v1431_v53 = vpack.c.b16 %v1421_v19, %v1421_v19 }
 0x405   :  { %v1360_v58 = vmul.f32 %v1324_v38, %v3299_v9  ;;  %v1361_v61 = vmul.f32 %v1325_v54, %v3301_v10  ;;  %v2742_v60 = vpop.permute.xlu2 %2741  ;;  %v1441_v47 = vsel %vm525_vm1, %v1430_v43, 0  ;;  %v1444_v30 = vsel %vm525_vm1, %v1431_v53, 0 }
 0x406   :  { %v2744_v57 = vunpack.i.h.bf16 %v2742_v60  ;;  %v2743_v25 = vunpack.i.l.bf16 %v2742_v60  ;;  %1449 = vmatpush.bf16.msrb.mxu2 %v1441_v47  ;;  %1472 = vmatpush.bf16.msra.mxu3 %v1444_v30  ;;  %v3580_v30 = vld [vmem:[#allocation8 + $0x10] sm:$0xff] }
 0x407   :  { %v1373_v50 = vpack.c.bf16 %v1361_v61, %v1360_v58 }
 0x408   :  { %v1252_v26 = vsel %vm634_vm9, %v2743_v25, %v2744_v57  ;;  %v1253_v21 = vsel %vm634_vm9, %v2744_v57, %v2743_v25 }
 0x409   :  { %1382 = vst [vmem:[#allocation3 + $0x28] sm:$0xff] %v1373_v50  ;;  %v1296_v9 = vpack.c.bf16 %v1252_v26, %v1253_v21 }
 0x40b   :  { %v1314_v27 = vunpack.c.l.bf16 %v1296_v9  ;;  %v1315_v10 = vunpack.c.h.bf16 %v1296_v9 }
 0x40c   :  { %v2722_v45 = vpop.permute.xlu1 %2721  ;;  %v2717_v32 = vpop.permute.xlu0 %2716 }
 0x40d   :  { %v1350_v51 = vmul.f32 %v1314_v27, %v3343_v35  ;;  %v1351_v62 = vmul.f32 %v1315_v10, %v3345_v48  ;;  %v2724_v33 = vunpack.i.h.bf16 %v2722_v45  ;;  %v2723_v41 = vunpack.i.l.bf16 %v2722_v45 }
 0x40e   :  { %v2719_v11 = vunpack.i.h.bf16 %v2717_v32  ;;  %v2718_v36 = vunpack.i.l.bf16 %v2717_v32  ;;  %v1344_v48 = vunpack.c.l.bf16 %v3562_v5  ;;  %v1336_v27 = vunpack.c.l.bf16 %v3580_v30 }
 0x40f   :  { %v1368_v12 = vpack.c.bf16 %v1351_v62, %v1350_v51  ;;  %v1288_v49 = vsel %vm676_vm7, %v2723_v41, %v2724_v33  ;;  %v1289_v55 = vsel %vm676_vm7, %v2724_v33, %v2723_v41  ;;  %v1337_v10 = vunpack.c.h.bf16 %v3580_v30 }
 0x410   :  { %v1303_v23 = vpack.c.bf16 %v1289_v55, %v1288_v49  ;;  %v1282_v24 = vsel %vm669_vm4, %v2718_v36, %v2719_v11  ;;  %v1283_v35 = vsel %vm669_vm4, %v2719_v11, %v2718_v36  ;;  %v3598_v55 = vld [vmem:[#allocation8 + $0x8] sm:$0xff] }
 0x411   :  { %1377 = vst [vmem:[#allocation3] sm:$0xff] %v1368_v12  ;;  %v1302_v7 = vpack.c.bf16 %v1283_v35, %v1282_v24 }
 0x412   :  { %v1328_v63 = vunpack.c.l.bf16 %v1303_v23  ;;  %v1329_v40 = vunpack.c.h.bf16 %v1303_v23 }
 0x413   :  { %v1326_v46 = vunpack.c.l.bf16 %v1302_v7  ;;  %v1327_v44 = vunpack.c.h.bf16 %v1302_v7 }
 0x414   :  { %v1364_v19 = vmul.f32 %v1328_v63, %v3315_v16  ;;  %v1365_v38 = vmul.f32 %v1329_v40, %v3323_v3  ;;  %v2737_v54 = vpop.permute.xlu1 %2736  ;;  %v2732_v43 = vpop.permute.xlu0 %2731 }
 0x415   :  { %v1362_v53 = vmul.f32 %v1344_v48, %v1326_v46  ;;  %v1363_v58 = vmul.f32 %v1345_v20, %v1327_v44  ;;  %v2739_v61 = vunpack.i.h.bf16 %v2737_v54  ;;  %v2738_v60 = vunpack.i.l.bf16 %v2737_v54 }
 0x416   :  { %v1375_v47 = vpack.c.bf16 %v1365_v38, %v1364_v19  ;;  %v2734_v57 = vunpack.i.h.bf16 %v2732_v43  ;;  %v2733_v25 = vunpack.i.l.bf16 %v2732_v43  ;;  %v1334_v46 = vunpack.c.l.bf16 %v3598_v55 }
 0x417   :  { %v1374_v50 = vpack.c.bf16 %v1363_v58, %v1362_v53  ;;  %v1270_v16 = vsel %vm655_vm10, %v2738_v60, %v2739_v61  ;;  %v1271_v3 = vsel %vm655_vm10, %v2739_v61, %v2738_v60  ;;  %v1335_v44 = vunpack.c.h.bf16 %v3598_v55  ;;  %v2569_v60 = vld [vmem:[#allocation3 + $0x24] sm:$0xf0] }
 0x418   :  { %1384 = vst [vmem:[#allocation3 + $0x38] sm:$0xff] %v1375_v47  ;;  %v1299_v26 = vpack.c.bf16 %v1270_v16, %v1271_v3  ;;  %v1264_v21 = vsel %vm648_vm5, %v2733_v25, %v2734_v57  ;;  %v1265_v9 = vsel %vm648_vm5, %v2734_v57, %v2733_v25  ;;  %v2368_v47 = vld [vmem:[#allocation3 + $0x28] sm:$0xf0]  ;;  %v2568_v16 = vld [vmem:[#allocation3 + $0x24] sm:$0xf] }
 0x419   :  { %1383 = vst [vmem:[#allocation3 + $0x30] sm:$0xff] %v1374_v50  ;;  %v1298_v45 = vpack.c.bf16 %v1264_v21, %v1265_v9  ;;  %v2366_v50 = vld [vmem:[#allocation3 + $0x20] sm:$0xf]  ;;  %v855_v21 = vpop.f32.mrf.mxu2  ;;  %v878_v9 = vpop.f32.mrf.mxu3 }
 0x41a   :  { %v1320_v32 = vunpack.c.l.bf16 %v1299_v26  ;;  %v1321_v51 = vunpack.c.h.bf16 %v1299_v26  ;;  %v2367_v3 = vor.u32 %v2569_v60, %v2366_v50  ;;  %v2371_v26 = vor.u32 %v2568_v16, %v2368_v47 }
 0x41b   :  { %v1318_v62 = vunpack.c.l.bf16 %v1298_v45  ;;  %v1319_v33 = vunpack.c.h.bf16 %v1298_v45  ;;  %v367_v60 = vadd.f32 %v3367_v17, %v3225_v4  ;;  %v389_v17 = vadd.f32 %v3373_v34, %v3228_v8 }
 0x41c   :  { %v1356_v41 = vmul.f32 %v1320_v32, %v3347_v29  ;;  %v1357_v11 = vmul.f32 %v1321_v51, %v3353_v39  ;;  %v2747_v36 = vpop.permute.xlu0 %2746  ;;  %v884_v32 = vrot.slane %v878_v9, 7  ;;  %v3797_v51 = vlaneseq }
 0x41d   :  { %v1354_v12 = vmul.f32 %v1336_v27, %v1318_v62  ;;  %v1355_v49 = vmul.f32 %v1337_v10, %v1319_v33  ;;  %v2749_v23 = vunpack.i.h.bf16 %v2747_v36  ;;  %v2748_v24 = vunpack.i.l.bf16 %v2747_v36 }
 0x41e   :  { %v1371_v35 = vpack.c.bf16 %v1357_v11, %v1356_v41  ;;  %vm3611_vm12 = vcmp.lt.s32.totalorder %v3797_v51, 256 }
 0x41f   :  { %v1370_v7 = vpack.c.bf16 %v1355_v49, %v1354_v12  ;;  %v1258_v63 = vsel %vm641_vm8, %v2748_v24, %v2749_v23  ;;  %v1259_v29 = vsel %vm641_vm8, %v2749_v23, %v2748_v24  ;;  %v2571_v39 = vld [vmem:[#allocation3 + $0x34] sm:$0xf0]  ;;  %v2376_v40 = vld [vmem:[#allocation3 + $0x38] sm:$0xf0]  ;;  %v886_v12 = vsel %vm885_vm11, %v855_v21, %v884_v32 }
 0x420   :  { %1380 = vst [vmem:[#allocation3 + $0x18] sm:$0xff] %v1371_v35  ;;  %v1297_v19 = vpack.c.bf16 %v1258_v63, %v1259_v29  ;;  %v2374_v38 = vld [vmem:[#allocation3 + $0x30] sm:$0xf]  ;;  %v2570_v54 = vld [vmem:[#allocation3 + $0x34] sm:$0xf] }
 0x421   :  { %1379 = vst [vmem:[#allocation3 + $0x10] sm:$0xff] %v1370_v7  ;;  %v2375_v43 = vor.u32 %v2571_v39, %v2374_v38  ;;  %v2379_v53 = vor.u32 %v2570_v54, %v2376_v40  ;;  %v857_v24 = vpop.f32.mrf.mxu2  ;;  %v880_v35 = vpop.f32.mrf.mxu3  ;;  %v2350_v7 = vld [vmem:[#allocation3] sm:$0xf]  ;;  %v2564_v29 = vld [vmem:[#allocation3 + $0x4] sm:$0xf] }
 0x422   :  { %v1316_v58 = vunpack.c.l.bf16 %v1297_v19  ;;  %v1317_v61 = vunpack.c.h.bf16 %v1297_v19  ;;  %892 = vst.msk [vmem:[#allocation4] ss:$4 sm:$0x3] %vm3611_vm12, %v886_v12 }
 0x423   :  { %1450 = vmatpush.bf16.msrb.mxu2 %v2375_v43  ;;  %1473 = vmatpush.bf16.msra.mxu3 %v2379_v53 }
 0x424   :  { %v1352_v57 = vmul.f32 %v1334_v46, %v1316_v58  ;;  %v1353_v25 = vmul.f32 %v1335_v44, %v1317_v61 }
 0x426   :  { %v1369_v45 = vpack.c.bf16 %v1353_v25, %v1352_v57 }
 0x427   :  { %1451 = vmatpush.bf16.msrb.mxu2 %v2367_v3  ;;  %1474 = vmatpush.bf16.msra.mxu3 %v2371_v26  ;;  %v2567_v33 = vld [vmem:[#allocation3 + $0x14] sm:$0xf0]  ;;  %v2360_v41 = vld [vmem:[#allocation3 + $0x18] sm:$0xf0] }
 0x428   :  { %1378 = vst [vmem:[#allocation3 + $0x8] sm:$0xff] %v1369_v45  ;;  %v2358_v11 = vld [vmem:[#allocation3 + $0x10] sm:$0xf]  ;;  %v2566_v36 = vld [vmem:[#allocation3 + $0x14] sm:$0xf] }
 0x429   :  { %v2359_v49 = vor.u32 %v2567_v33, %v2358_v11  ;;  %v2363_v23 = vor.u32 %v2566_v36, %v2360_v41 }
 0x42b   :  { %1452 = vmatpush.bf16.msrb.mxu2 %v2359_v49  ;;  %1475 = vmatpush.bf16.msra.mxu3 %v2363_v23 }
 0x42f   :  { %v2565_v63 = vld [vmem:[#allocation3 + $0x4] sm:$0xf0]  ;;  %v2352_v39 = vld [vmem:[#allocation3 + $0x8] sm:$0xf0] }
 0x430   :  { %v2351_v40 = vor.u32 %v2565_v63, %v2350_v7  ;;  %v2355_v19 = vor.u32 %v2564_v29, %v2352_v39 }
 0x432   :  { %1453 = vmatpush.bf16.msrb.mxu2 %v2351_v40  ;;  %1476 = vmatpush.bf16.msra.mxu3 %v2355_v19 }
 0x435   :  { %2380 = vmatmul.msk.bf16.vlgmr.msrb.gmra.mxu2 %vm515_vm2, %v3485_v52  ;;  %2383 = vmatmul.msk.bf16.vlgmr.msra.gmra.mxu3 %vm515_vm2, %v3485_v52 }
 0x445   :  { %2381 = vmatmul.msk.bf16.gmra.mxu2 %vm515_vm2, %v3494_v2  ;;  %2384 = vmatmul.msk.bf16.gmra.mxu3 %vm515_vm2, %v3494_v2  ;;  %v386_v2 = vadd.f32 %v3369_v28, %v3225_v4 }
 0x455   :  { %2385 = vmatmul.msk.bf16.gmra.mxu3 %vm515_vm2, %v3422_v13  ;;  %2382 = vmatmul.msk.bf16.gmra.mxu2 %vm515_vm2, %v3422_v13 }
 0x4b8   :  { %v1455_v38 = vpop.f32.mrf.mxu2  ;;  %v1478_v54 = vpop.f32.mrf.mxu3 }
 0x4b9   :  { %v1507_v43 = vadd.f32 %v1455_v38, %v3215_v59  ;;  %v1508_v53 = vadd.f32 %v1478_v54, %v3221_v0  ;;  %v370_v0 = vadd.f32 %v3371_v42, %v3228_v8  ;;  %v372_v42 = vadd.f32 %v3375_v31, %v3232_v22 }
 0x4ba   :  { %v391_v8 = vadd.f32 %v3377_v15, %v3232_v22 }
 0x4bb   :  { %v1515_v58 = vmul.f32 0.5, %v1507_v43  ;;  %v1516_v61 = vmul.f32 0.5, %v1508_v53 }
 0x4bd   :  { %2852 = vtanh.f32 %v1515_v58 }
 0x4be   :  { %2854 = vtanh.f32 %v1516_v61 }
 0x4c0   :  { %v1457_v47 = vpop.f32.mrf.mxu2  ;;  %v1480_v57 = vpop.f32.mrf.mxu3 }
 0x4c1   :  { %v1509_v25 = vadd.f32 %v1457_v47, %v367_v60  ;;  %v1510_v50 = vadd.f32 %v1480_v57, %v386_v2 }
 0x4c3   :  { %v1523_v16 = vmul.f32 0.5, %v1509_v25  ;;  %v1524_v3 = vmul.f32 0.5, %v1510_v50  ;;  %v2853_v59 = vpop.eup %2852 }
 0x4c4   :  { %v2855_v26 = vpop.eup %2854  ;;  %v1519_v45 = vmul.f32 0.5, %v2853_v59 }
 0x4c5   :  { %2856 = vtanh.f32 %v1523_v16  ;;  %v1520_v51 = vmul.f32 0.5, %v2855_v26 }
 0x4c6   :  { %2858 = vtanh.f32 %v1524_v3  ;;  %v1521_v36 = vadd.f32 0.5, %v1519_v45 }
 0x4c7   :  { %v1522_v34 = vadd.f32 0.5, %v1520_v51 }
 0x4c8   :  { %v1460_v21 = vpop.f32.mrf.mxu2  ;;  %v1483_v4 = vpop.f32.mrf.mxu3  ;;  %v1541_v39 = vmul.f32 %v1521_v36, %v3520_v56 }
 0x4c9   :  { %v1511_v28 = vadd.f32 %v1460_v21, %v370_v0  ;;  %v1512_v9 = vadd.f32 %v1483_v4, %v389_v17  ;;  %v1542_v19 = vmul.f32 %v1522_v34, %v3522_v1 }
 0x4cb   :  { %v2857_v32 = vpop.eup %2856  ;;  %2860 = vtanh.f32 %v1511_v28 }
 0x4cc   :  { %v2859_v33 = vpop.eup %2858  ;;  %v1527_v41 = vmul.f32 0.5, %v2857_v32  ;;  %2862 = vtanh.f32 %v1512_v9 }
 0x4cd   :  { %v1528_v11 = vmul.f32 0.5, %v2859_v33 }
 0x4ce   :  { %v1529_v12 = vadd.f32 0.5, %v1527_v41 }
 0x4cf   :  { %v1530_v35 = vadd.f32 0.5, %v1528_v11 }
 0x4d0   :  { %v1462_v49 = vpop.f32.mrf.mxu2  ;;  %v1485_v23 = vpop.f32.mrf.mxu3 }
 0x4d1   :  { %v2861_v24 = vpop.eup %2860  ;;  %v1513_v7 = vadd.f32 %v1462_v49, %v372_v42  ;;  %v1514_v63 = vadd.f32 %v1485_v23, %v391_v8 }
 0x4d2   :  { %v2863_v29 = vpop.eup %2862  ;;  %v1543_v40 = vmul.f32 %v2861_v24, %v1529_v12 }
 0x4d3   :  { %v1544_v38 = vmul.f32 %v2863_v29, %v1530_v35  ;;  %v1533_v54 = vmul.f32 0.5, %v1513_v7  ;;  %v1534_v43 = vmul.f32 0.5, %v1514_v63 }
 0x4d4   :  { %v1545_v31 = vadd.f32 %v1543_v40, %v1541_v39 }
 0x4d5   :  { %v1546_v53 = vadd.f32 %v1544_v38, %v1542_v19  ;;  %2864 = vtanh.f32 %v1533_v54 }
 0x4d6   :  { %2866 = vtanh.f32 %v1534_v43  ;;  %v1616_v43 = vld [vmem:[#allocation8 + $0x40] sm:$0xff] }
 0x4d7   :  { %2868 = vtanh.f32 %v1545_v31 }
 0x4d8   :  { %2870 = vtanh.f32 %v1546_v53 }
 0x4db   :  { %v2865_v22 = vpop.eup %2864 }
 0x4dc   :  { %v1537_v15 = vmul.f32 0.5, %v2865_v22  ;;  %v2867_v58 = vpop.eup %2866 }
 0x4dd   :  { %v1538_v60 = vmul.f32 0.5, %v2867_v58  ;;  %v2869_v2 = vpop.eup %2868 }
 0x4de   :  { %v1539_v61 = vadd.f32 0.5, %v1537_v15  ;;  %v2871_v57 = vpop.eup %2870 }
 0x4df   :  { %v1540_v56 = vadd.f32 0.5, %v1538_v60 }
 0x4e0   :  { %v1549_v47 = vmul.f32 %v2869_v2, %v1539_v61  ;;  %v1651_v2 = vunpack.c.l.bf16 %v1616_v43 }
 0x4e1   :  { %v1550_v25 = vmul.f32 %v2871_v57, %v1540_v56 }
 0x4e3   :  { %v1603_v1 = vpack.c.bf16 %v1550_v25, %v1549_v47  ;;  %v2760_v50 = vpack.i.bf16 %v1550_v25, %v1549_v47  ;;  %v1652_v47 = vunpack.c.h.bf16 %v1616_v43 }
 0x4e5   :  { %v1625_v16 = vunpack.c.l.bf16 %v1603_v1  ;;  %v1626_v3 = vunpack.c.h.bf16 %v1603_v1  ;;  %2761 = vrot.lane.b32.xlu0 %v2760_v50, %s3015_s20  ;;  %2756 = vrot.lane.b32.xlu2 %v2760_v50, %s3019_s24 }
 0x4e6   :  { %2751 = vrot.lane.b32.xlu1 %v2760_v50, %s3016_s21 }
 0x4e7   :  { %v1661_v59 = vmul.f32 %v1625_v16, %v1340_v6  ;;  %v1662_v0 = vmul.f32 %v1626_v3, %v1341_v18  ;;  %v1611_v16 = vld [vmem:[#allocation8 + $0x18] sm:$0xff] }
 0x4e9   :  { %v1675_v17 = vpack.c.bf16 %v1662_v0, %v1661_v59 }
 0x4eb   :  { %1684 = vst [vmem:[#allocation3 + $0x20] sm:$0xff] %v1675_v17 }
 0x4ed   :  { %2776 = vrot.lane.b32.xlu0 %v2760_v50, %s3018_s23  ;;  %2771 = vrot.lane.b32.xlu2 %v2760_v50, %s3020_s25 }
 0x4ee   :  { %2766 = vrot.lane.b32.xlu1 %v2760_v50, %s3014_s19 }
 0x4f5   :  { %2786 = vrot.lane.b32.xlu2 %v2760_v50, %s3021_s26 }
 0x4f6   :  { %2781 = vrot.lane.b32.xlu1 %v2760_v50, %s3017_s22 }
 0x53f   :  { %v2757_v26 = vpop.permute.xlu2 %2756 }
 0x540   :  { %v2759_v21 = vunpack.i.h.bf16 %v2757_v26  ;;  %v2758_v4 = vunpack.i.l.bf16 %v2757_v26 }
 0x542   :  { %v1585_v6 = vsel %vm669_vm4, %v2758_v4, %v2759_v21  ;;  %v1586_v14 = vsel %vm669_vm4, %v2759_v21, %v2758_v4 }
 0x543   :  { %v1605_v18 = vpack.c.bf16 %v1586_v14, %v1585_v6  ;;  %v1613_v6 = vld [vmem:[#allocation8 + $0x28] sm:$0xff] }
 0x545   :  { %v1629_v28 = vunpack.c.l.bf16 %v1605_v18  ;;  %v1630_v9 = vunpack.c.h.bf16 %v1605_v18 }
 0x547   :  { %v1665_v45 = vmul.f32 %v1629_v28, %v1344_v48  ;;  %v1666_v32 = vmul.f32 %v1630_v9, %v1345_v20  ;;  %v2772_v51 = vpop.permute.xlu2 %2771  ;;  %v1641_v28 = vunpack.c.l.bf16 %v1611_v16 }
 0x548   :  { %v2774_v33 = vunpack.i.h.bf16 %v2772_v51  ;;  %v2773_v41 = vunpack.i.l.bf16 %v2772_v51  ;;  %v1642_v51 = vunpack.c.h.bf16 %v1611_v16  ;;  %v2404_v16 = vld [vmem:[#allocation3 + $0x20] sm:$0xf] }
 0x549   :  { %v1677_v11 = vpack.c.bf16 %v1666_v32, %v1665_v45 }
 0x54a   :  { %v1567_v36 = vsel %vm648_vm5, %v2773_v41, %v2774_v33  ;;  %v1568_v42 = vsel %vm648_vm5, %v2774_v33, %v2773_v41 }
 0x54b   :  { %1686 = vst [vmem:[#allocation3 + $0x30] sm:$0xff] %v1677_v11  ;;  %v1601_v8 = vpack.c.bf16 %v1567_v36, %v1568_v42  ;;  %v1645_v36 = vunpack.c.l.bf16 %v1613_v6 }
 0x54d   :  { %v1621_v34 = vunpack.c.l.bf16 %v1601_v8  ;;  %v1622_v12 = vunpack.c.h.bf16 %v1601_v8 }
 0x54f   :  { %v1657_v48 = vmul.f32 %v1621_v34, %v1336_v27  ;;  %v1658_v5 = vmul.f32 %v1622_v12, %v1337_v10  ;;  %v2787_v20 = vpop.permute.xlu2 %2786  ;;  %v1615_v10 = vld [vmem:[#allocation8 + $0x38] sm:$0xff]  ;;  %v1646_v34 = vunpack.c.h.bf16 %v1613_v6 }
 0x550   :  { %v2789_v49 = vunpack.i.h.bf16 %v2787_v20  ;;  %v2788_v23 = vunpack.i.l.bf16 %v2787_v20  ;;  %v1649_v15 = vunpack.c.l.bf16 %v1615_v10 }
 0x551   :  { %v1673_v24 = vpack.c.bf16 %v1658_v5, %v1657_v48 }
 0x552   :  { %v1561_v35 = vsel %vm641_vm8, %v2788_v23, %v2789_v49  ;;  %v1562_v7 = vsel %vm641_vm8, %v2789_v49, %v2788_v23  ;;  %v2412_v43 = vld [vmem:[#allocation3 + $0x30] sm:$0xf] }
 0x553   :  { %1682 = vst [vmem:[#allocation3 + $0x10] sm:$0xff] %v1673_v24  ;;  %v1600_v63 = vpack.c.bf16 %v1561_v35, %v1562_v7 }
 0x555   :  { %v1619_v29 = vunpack.c.l.bf16 %v1600_v63  ;;  %v1620_v39 = vunpack.c.h.bf16 %v1600_v63 }
 0x557   :  { %v1655_v27 = vmul.f32 %v1619_v29, %v1334_v46  ;;  %v1656_v30 = vmul.f32 %v1620_v39, %v1335_v44  ;;  %v2762_v40 = vpop.permute.xlu0 %2761  ;;  %v1650_v46 = vunpack.c.h.bf16 %v1615_v10 }
 0x558   :  { %v2764_v19 = vunpack.i.h.bf16 %v2762_v40  ;;  %v2763_v38 = vunpack.i.l.bf16 %v2762_v40  ;;  %v2752_v54 = vpop.permute.xlu1 %2751 }
 0x559   :  { %v1672_v31 = vpack.c.bf16 %v1656_v30, %v1655_v27  ;;  %v2754_v53 = vunpack.i.h.bf16 %v2752_v54  ;;  %v2753_v22 = vunpack.i.l.bf16 %v2752_v54 }
 0x55a   :  { %v1591_v58 = vsel %vm676_vm7, %v2763_v38, %v2764_v19  ;;  %v1592_v61 = vsel %vm676_vm7, %v2764_v19, %v2763_v38  ;;  %v1608_v38 = vld [vmem:[#allocation8] sm:$0xff] }
 0x55b   :  { %1681 = vst [vmem:[#allocation3 + $0x8] sm:$0xff] %v1672_v31  ;;  %v1606_v55 = vpack.c.bf16 %v1592_v61, %v1591_v58  ;;  %v1597_v44 = vsel %vm683_vm3, %v2753_v22, %v2754_v53  ;;  %v1598_v60 = vsel %vm683_vm3, %v2754_v53, %v2753_v22  ;;  %v2396_v6 = vld [vmem:[#allocation3 + $0x10] sm:$0xf] }
 0x55c   :  { %v1607_v56 = vpack.c.bf16 %v1598_v60, %v1597_v44  ;;  %v1635_v60 = vunpack.c.l.bf16 %v1608_v38 }
 0x55d   :  { %v1631_v57 = vunpack.c.l.bf16 %v1606_v55  ;;  %v1632_v25 = vunpack.c.h.bf16 %v1606_v55 }
 0x55e   :  { %v1633_v1 = vunpack.c.l.bf16 %v1607_v56  ;;  %v1634_v50 = vunpack.c.h.bf16 %v1607_v56 }
 0x55f   :  { %v1667_v3 = vmul.f32 %v1649_v15, %v1631_v57  ;;  %v1668_v59 = vmul.f32 %v1650_v46, %v1632_v25  ;;  %v2777_v0 = vpop.permute.xlu0 %2776  ;;  %v2578_v15 = vld [vmem:[#allocation3 + $0x34] sm:$0xf] }
 0x560   :  { %v1669_v17 = vmul.f32 %v1651_v2, %v1633_v1  ;;  %v1670_v26 = vmul.f32 %v1652_v47, %v1634_v50  ;;  %v2779_v21 = vunpack.i.h.bf16 %v2777_v0  ;;  %v2778_v4 = vunpack.i.l.bf16 %v2777_v0  ;;  %v2767_v14 = vpop.permute.xlu1 %2766 }
 0x561   :  { %v1678_v18 = vpack.c.bf16 %v1668_v59, %v1667_v3  ;;  %v2769_v9 = vunpack.i.h.bf16 %v2767_v14  ;;  %v2768_v45 = vunpack.i.l.bf16 %v2767_v14  ;;  %v1636_v2 = vunpack.c.h.bf16 %v1608_v38  ;;  %v2576_v59 = vld [vmem:[#allocation3 + $0x24] sm:$0xf]  ;;  %v2574_v14 = vld [vmem:[#allocation3 + $0x14] sm:$0xf] }
 0x562   :  { %v1679_v32 = vpack.c.bf16 %v1670_v26, %v1669_v17  ;;  %v1573_v33 = vsel %vm655_vm10, %v2778_v4, %v2779_v21  ;;  %v1574_v41 = vsel %vm655_vm10, %v2779_v21, %v2778_v4 }
 0x563   :  { %1687 = vst [vmem:[#allocation3 + $0x38] sm:$0xff] %v1678_v18  ;;  %v1602_v11 = vpack.c.bf16 %v1573_v33, %v1574_v41  ;;  %v1579_v42 = vsel %vm662_vm6, %v2768_v45, %v2769_v9  ;;  %v1580_v8 = vsel %vm662_vm6, %v2769_v9, %v2768_v45  ;;  %v2573_v9 = vld [vmem:[#allocation3 + $0x4] sm:$0xf0] }
 0x564   :  { %v1604_v12 = vpack.c.bf16 %v1580_v8, %v1579_v42  ;;  %v1723_v48 = vunpack.c.l.b16 %v1679_v32  ;;  %v1724_v5 = vunpack.c.h.b16 %v1679_v32 }
 0x565   :  { %v1623_v20 = vunpack.c.l.bf16 %v1602_v11  ;;  %v1624_v49 = vunpack.c.h.bf16 %v1602_v11  ;;  %v1185_v11 = vpop.f32.mrf.mxu1 }
 0x566   :  { %v1627_v23 = vunpack.c.l.bf16 %v1604_v12  ;;  %v1628_v24 = vunpack.c.h.bf16 %v1604_v12  ;;  %v1733_v35 = vpack.c.b16 %v1723_v48, %v1723_v48  ;;  %v1734_v7 = vpack.c.b16 %v1724_v5, %v1724_v5  ;;  %v2874_v48 = vld [vmem:[%s3781_s4 + $0x8] sm:$0xff]  ;;  %v1465_v5 = vpop.f32.mrf.mxu2  ;;  %s3022_s4 = smov 126  }
 0x567   :  { %v1659_v63 = vmul.f32 %v1641_v28, %v1623_v20  ;;  %v1660_v29 = vmul.f32 %v1642_v51, %v1624_v49  ;;  %v2390_v51 = vld [vmem:[#allocation3 + $0x8] sm:$0xf0]  ;;  %v1191_v42 = vrot.slane %v1185_v11, 7 }
 0x568   :  { %v1663_v39 = vmul.f32 %v1645_v36, %v1627_v23  ;;  %v1664_v27 = vmul.f32 %v1646_v34, %v1628_v24  ;;  %v2782_v30 = vpop.permute.xlu1 %2781  ;;  %v1744_v10 = vsel %vm525_vm1, %v1733_v35, 0  ;;  %v1747_v40 = vsel %vm525_vm1, %v1734_v7, 0  ;;  %v1162_v36 = vpop.f32.mrf.mxu0 }
 0x569   :  { %v1674_v19 = vpack.c.bf16 %v1660_v29, %v1659_v63  ;;  %v2784_v54 = vunpack.i.h.bf16 %v2782_v30  ;;  %v2783_v31 = vunpack.i.l.bf16 %v2782_v30  ;;  %1752 = vmatpush.bf16.msra.mxu0 %v1744_v10  ;;  %1771 = vmatpush.bf16.msra.mxu1 %v1747_v40  ;;  %v1192_v8 = vsel %vm885_vm11, %v1162_v36, %v1191_v42  ;;  %v2583_v42 = vld [vmem:[#allocation11 + $0x18] sm:$0xff] }
 0x56a   :  { %v1676_v53 = vpack.c.bf16 %v1664_v27, %v1663_v39  ;;  %v2579_v22 = vld [vmem:[#allocation3 + $0x34] sm:$0xf0]  ;;  %v2414_v58 = vld [vmem:[#allocation3 + $0x38] sm:$0xf0] }
 0x56b   :  { %1683 = vst [vmem:[#allocation3 + $0x18] sm:$0xff] %v1674_v19  ;;  %v1555_v61 = vsel %vm634_vm9, %v2783_v31, %v2784_v54  ;;  %v1556_v46 = vsel %vm634_vm9, %v2784_v54, %v2783_v31  ;;  %v2413_v55 = vor.u32 %v2579_v22, %v2412_v43  ;;  %v2417_v44 = vor.u32 %v2578_v15, %v2414_v58 }
 0x56c   :  { %1685 = vst [vmem:[#allocation3 + $0x28] sm:$0xff] %v1676_v53  ;;  %v1599_v47 = vpack.c.bf16 %v1555_v61, %v1556_v46 }
 0x56d   :  { %1753 = vmatpush.bf16.msra.mxu0 %v2413_v55  ;;  %1772 = vmatpush.bf16.msra.mxu1 %v2417_v44  ;;  %1195 = vst.msk [vmem:[#allocation4 + $0x1] ss:$4 sm:$0x3] %vm3611_vm12, %v1192_v8  ;;  %v1187_v34 = vpop.f32.mrf.mxu1  ;;  %v2591_v8 = vld [vmem:[#allocation11 + $0x58] sm:$0xff] }
 0x56e   :  { %v1617_v56 = vunpack.c.l.bf16 %v1599_v47  ;;  %v1618_v57 = vunpack.c.h.bf16 %v1599_v47  ;;  %v1467_v7 = vpop.f32.mrf.mxu2  ;;  %v2582_v34 = vld [vmem:[#allocation11 + $0x10] sm:$0xff] }
 0x56f   :  { %v2599_v7 = vld [vmem:[%s3785_s8 + $0x18] sm:$0xff] }
 0x570   :  { %v1653_v25 = vmul.f32 %v1635_v60, %v1617_v56  ;;  %v1654_v1 = vmul.f32 %v1636_v2, %v1618_v57  ;;  %v1164_v12 = vpop.f32.mrf.mxu0 }
 0x571   :  { %v2590_v12 = vld [vmem:[#allocation11 + $0x50] sm:$0xff] }
 0x572   :  { %v1671_v50 = vpack.c.bf16 %v1654_v1, %v1653_v25  ;;  %v2575_v21 = vld [vmem:[#allocation3 + $0x14] sm:$0xf0]  ;;  %v2398_v4 = vld [vmem:[#allocation3 + $0x18] sm:$0xf0] }
 0x573   :  { %v2577_v3 = vld [vmem:[#allocation3 + $0x24] sm:$0xf0]  ;;  %v2406_v0 = vld [vmem:[#allocation3 + $0x28] sm:$0xf0]  ;;  %v2397_v18 = vor.u32 %v2575_v21, %v2396_v6  ;;  %v2401_v28 = vor.u32 %v2574_v14, %v2398_v4  ;;  %v2594_v21 = vld [vmem:[#allocation11 + $0x70] sm:$0xff] }
 0x574   :  { %1680 = vst [vmem:[#allocation3] sm:$0xff] %v1671_v50  ;;  %v2405_v17 = vor.u32 %v2577_v3, %v2404_v16  ;;  %v2409_v26 = vor.u32 %v2576_v59, %v2406_v0  ;;  %v2587_v0 = vld [vmem:[#allocation11 + $0x38] sm:$0xff]  ;;  %v2585_v4 = vld [vmem:[#allocation11 + $0x28] sm:$0xff]  ;;  %v2584_v14 = vld [vmem:[#allocation11 + $0x20] sm:$0xff] }
 0x575   :  { %2009 = vmatpush.bf16.msra.mxu2 %v2587_v0  ;;  %v2593_v6 = vld [vmem:[#allocation11 + $0x68] sm:$0xff] }
 0x576   :  { %1754 = vmatpush.bf16.msra.mxu0 %v2405_v17  ;;  %1773 = vmatpush.bf16.msra.mxu1 %v2409_v26  ;;  %v2595_v17 = vld [vmem:[#allocation11 + $0x78] sm:$0xff]  ;;  %v2586_v26 = vld [vmem:[#allocation11 + $0x30] sm:$0xff] }
 0x577   :  { %2022 = vmatpush.bf16.msrb.mxu3 %v2595_v17 }
 0x579   :  { %2010 = vmatpush.bf16.msra.mxu2 %v2586_v26 }
 0x57a   :  { %1755 = vmatpush.bf16.msra.mxu0 %v2397_v18  ;;  %1774 = vmatpush.bf16.msra.mxu1 %v2401_v28  ;;  %v2592_v18 = vld [vmem:[#allocation11 + $0x60] sm:$0xff] }
 0x57b   :  { %v2388_v45 = vld [vmem:[#allocation3] sm:$0xf]  ;;  %v2572_v32 = vld [vmem:[#allocation3 + $0x4] sm:$0xf]  ;;  %2023 = vmatpush.bf16.msrb.mxu3 %v2594_v21 }
 0x57c   :  { %v2389_v33 = vor.u32 %v2573_v9, %v2388_v45  ;;  %v2393_v41 = vor.u32 %v2572_v32, %v2390_v51 }
 0x57d   :  { %2011 = vmatpush.bf16.msra.mxu2 %v2585_v4 }
 0x57e   :  { %1756 = vmatpush.bf16.msra.mxu0 %v2389_v33  ;;  %1775 = vmatpush.bf16.msra.mxu1 %v2393_v41 }
 0x57f   :  { %2024 = vmatpush.bf16.msrb.mxu3 %v2593_v6 }
 0x581   :  { %2421 = vmatmul.msk.bf16.vlgmr.msra.gmra.mxu1 %vm515_vm2, %v3485_v52  ;;  %2418 = vmatmul.msk.bf16.vlgmr.msra.gmra.mxu0 %vm515_vm2, %v3485_v52  ;;  %v1488_v52 = vpop.f32.mrf.mxu3 }
 0x582   :  { %v1494_v20 = vrot.slane %v1488_v52, 7  ;;  %2012 = vmatpush.bf16.msra.mxu2 %v2584_v14  ;;  %v2589_v52 = vld [vmem:[#allocation11 + $0x48] sm:$0xff] }
 0x583   :  { %2025 = vmatpush.bf16.msrb.mxu3 %v2592_v18 }
 0x584   :  { %v1495_v24 = vsel %vm885_vm11, %v1465_v5, %v1494_v20  ;;  %v2580_v5 = vld [vmem:[#allocation11] sm:$0xff] }
 0x585   :  { %1498 = vst.msk [vmem:[#allocation4 + $0x2] ss:$4 sm:$0x3] %vm3611_vm12, %v1495_v24  ;;  %v2588_v20 = vld [vmem:[#allocation11 + $0x40] sm:$0xff]  ;;  %v2601_v24 = vld [vmem:[%s3785_s8 + $0x28] sm:$0xff] }
 0x586   :  { %2013 = vmatpush.bf16.msra.mxu2 %v2583_v42 }
 0x587   :  { %2026 = vmatpush.bf16.msrb.mxu3 %v2591_v8 }
 0x589   :  { %v1490_v35 = vpop.f32.mrf.mxu3 }
 0x58a   :  { %2014 = vmatpush.bf16.msra.mxu2 %v2582_v34  ;;  %v2600_v35 = vld [vmem:[%s3785_s8 + $0x20] sm:$0xff] }
 0x58b   :  { %2027 = vmatpush.bf16.msrb.mxu3 %v2590_v12 }
 0x58f   :  { %2028 = vmatpush.bf16.msrb.mxu3 %v2589_v52 }
 0x591   :  { %2422 = vmatmul.msk.bf16.gmra.mxu1 %vm515_vm2, %v2874_v48  ;;  %2419 = vmatmul.msk.bf16.gmra.mxu0 %vm515_vm2, %v2874_v48  ;;  %v2581_v48 = vld [vmem:[#allocation11 + $0x8] sm:$0xff] }
 0x592   :  { %2015 = vmatpush.bf16.msra.mxu2 %v2581_v48 }
 0x593   :  { %2029 = vmatpush.bf16.msrb.mxu3 %v2588_v20 }
 0x596   :  { %2016 = vmatpush.bf16.msra.mxu2 %v2580_v5 }
 0x5a1   :  { %2423 = vmatmul.msk.bf16.gmra.mxu1 %vm515_vm2, %v3422_v13  ;;  %2420 = vmatmul.msk.bf16.gmra.mxu0 %vm515_vm2, %v3422_v13 }
 0x5fe   :  { %v1777_v49 = vpop.f32.mrf.mxu1  ;;  %v1758_v23 = vpop.f32.mrf.mxu0 }
 0x5ff   :  { %v2603_v49 = vld [vmem:[%s3785_s8 + $0x38] sm:$0xff]  ;;  %v2602_v23 = vld [vmem:[%s3785_s8 + $0x30] sm:$0xff] }
 0x600   :  { %2104 = vmatpush.bf16.msrb.mxu2 %v2603_v49 }
 0x604   :  { %2105 = vmatpush.bf16.msrb.mxu2 %v2602_v23 }
 0x606   :  { %v1778_v63 = vpop.f32.mrf.mxu1  ;;  %v1759_v29 = vpop.f32.mrf.mxu0 }
 0x608   :  { %2106 = vmatpush.bf16.msrb.mxu2 %v2601_v24 }
 0x60c   :  { %2107 = vmatpush.bf16.msrb.mxu2 %v2600_v35 }
 0x60e   :  { %v1780_v39 = vpop.f32.mrf.mxu1  ;;  %v1761_v27 = vpop.f32.mrf.mxu0 }
 0x610   :  { %2108 = vmatpush.bf16.msrb.mxu2 %v2599_v7 }
 0x616   :  { %v1781_v30 = vpop.f32.mrf.mxu1  ;;  %v1762_v10 = vpop.f32.mrf.mxu0 }
 0x617   :  { %v2598_v10 = vld [vmem:[%s3785_s8 + $0x10] sm:$0xff] }
 0x618   :  { %2109 = vmatpush.bf16.msrb.mxu2 %v2598_v10 }
 0x61e   :  { %v1783_v40 = vpop.f32.mrf.mxu1  ;;  %v1764_v13 = vpop.f32.mrf.mxu0 }
 0x61f   :  { %v1789_v19 = vrot.slane %v1783_v40, 7 }
 0x621   :  { %v1790_v38 = vsel %vm885_vm11, %v1764_v13, %v1789_v19 }
 0x622   :  { %1793 = vst.msk [vmem:[#allocation4 + $0x3] ss:$4 sm:$0x3] %vm3611_vm12, %v1790_v38 }
 0x626   :  { %v1785_v54 = vpop.f32.mrf.mxu1  ;;  %v1766_v31 = vpop.f32.mrf.mxu0 }
 0x627   :  { %v2597_v31 = vld [vmem:[%s3785_s8 + $0x8] sm:$0xff] }
 0x628   :  { %2110 = vmatpush.bf16.msrb.mxu2 %v2597_v31 }
 0x629   :  { %v1794_v43 = vld [vmem:[#allocation4] sm:$0xff] }
 0x62a   :  { %1796 = vst [vmem:[#allocation1] ss:$2 sm:$0xff] %v1794_v43 }
 0x631   :  { %v1798_v53 = vld.sshfl [vmem:[#allocation1 + $0x8] sm:$0xff pattern:$0x75316420]  ;;  %v1797_v22 = vld.sshfl [vmem:[#allocation1] sm:$0xff pattern:$0x75316420] }
 0x632   :  { %1803 = vrot.lane.b32.xlu1 %v1798_v53, %s3014_s19  ;;  %1801 = vrot.lane.b32.xlu0 %v1797_v22, %s3014_s19  ;;  %v2790_v53 = vld [vmem:[%s3784_s7] ss:$0 sm:$0xff] }
 0x6a4   :  { %v1804_v15 = vpop.permute.xlu1 %1803  ;;  %v1802_v58 = vpop.permute.xlu0 %1801 }
 0x6a5   :  { %v1806_v61 = vsel %vm662_vm6, %v1804_v15, %v1802_v58  ;;  %v1805_v62 = vsel %vm662_vm6, %v1802_v58, %v1804_v15 }
 0x6a6   :  { %v1809_v46 = vrot.slane %v1806_v61, 4 }
 0x6a8   :  { %v1810_v55 = vsel %vm525_vm1, %v1805_v62, %v1809_v46 }
 0x6a9   :  { %v1812_v44 = vmax.f32 %v1794_v43, %v1810_v55  ;;  %v2596_v43 = vld [vmem:[%s3785_s8] sm:$0xff] }
 0x6aa   :  { %2111 = vmatpush.bf16.msrb.mxu2 %v2596_v43 }
 0x6ab   :  { %1814 = vst [vmem:[#allocation1] ss:$2 sm:$0xff] %v1812_v44 }
 0x6b2   :  { %v1816_v60 = vld.sshfl [vmem:[#allocation1 + $0x8] sm:$0xff pattern:$0x75316420]  ;;  %v1815_v2 = vld.sshfl [vmem:[#allocation1] sm:$0xff pattern:$0x75316420] }
 0x6b3   :  { %1821 = vrot.lane.b32.xlu0 %v1816_v60, %s3022_s4  ;;  %1819 = vrot.lane.b32.xlu2 %v1815_v2, %s3022_s4 }
 0x70d   :  { %v1820_v47 = vpop.permute.xlu2 %1819 }
 0x725   :  { %v1822_v56 = vpop.permute.xlu0 %1821 }
 0x726   :  { %v1825_v57 = vsel %vm1823_vm13, %v1822_v56, %v1820_v47  ;;  %v1824_v1 = vsel %vm1823_vm13, %v1820_v47, %v1822_v56 }
 0x727   :  { %v1828_v25 = vrot.slane %v1825_v57, 4 }
 0x729   :  { %v1829_v50 = vsel %vm525_vm1, %v1824_v1, %v1828_v25 }
 0x72a   :  { %v1831_v16 = vmax.f32 %v1812_v44, %v1829_v50  ;;  %v2791_v44 = vld [vmem:[%s3786_s9] ss:$0 sm:$0xff] }
 0x72c   :  { %1833 = vst [vmem:[#allocation1] ss:$2 sm:$0xff] %v1831_v16 }
 0x733   :  { %v1835_v3 = vld.sshfl [vmem:[#allocation1 + $0x8] sm:$0xff pattern:$0x75316420]  ;;  %v1834_v59 = vld.sshfl [vmem:[#allocation1] sm:$0xff pattern:$0x75316420] }
 0x734   :  { %1840 = vrot.lane.b32.xlu2 %v1835_v3, %s3015_s20  ;;  %1838 = vrot.lane.b32.xlu1 %v1834_v59, %s3015_s20 }
 0x78e   :  { %v1841_v28 = vpop.permute.xlu2 %1840 }
 0x7a6   :  { %v1839_v9 = vpop.permute.xlu1 %1838 }
 0x7a7   :  { %v1843_v45 = vsel %vm676_vm7, %v1841_v28, %v1839_v9  ;;  %v1842_v51 = vsel %vm676_vm7, %v1839_v9, %v1841_v28 }
 0x7a8   :  { %v1846_v32 = vrot.slane %v1843_v45, 4 }
 0x7aa   :  { %v1847_v33 = vsel %vm525_vm1, %v1842_v51, %v1846_v32 }
 0x7ab   :  { %v1849_v41 = vmax.f32 %v1831_v16, %v1847_v33 }
 0x7ad   :  { %1851 = vst [vmem:[#allocation1] ss:$2 sm:$0xff] %v1849_v41 }
 0x7b4   :  { %v1853_v11 = vld.sshfl [vmem:[#allocation1 + $0x8] sm:$0xff pattern:$0x75316420]  ;;  %v1852_v36 = vld.sshfl [vmem:[#allocation1] sm:$0xff pattern:$0x75316420] }
 0x7b5   :  { %1858 = vrot.lane.b32.xlu1 %v1853_v11, %s3023_s13  ;;  %1856 = vrot.lane.b32.xlu0 %v1852_v36, %s3023_s13 }
 0x827   :  { %v1859_v63 = vpop.permute.xlu1 %1858  ;;  %v1857_v29 = vpop.permute.xlu0 %1856 }
 0x828   :  { %v1862_v39 = vsel %vm1860_vm14, %v1859_v63, %v1857_v29  ;;  %v1861_v30 = vsel %vm1860_vm14, %v1857_v29, %v1859_v63 }
 0x829   :  { %v1865_v27 = vrot.slane %v1862_v39, 4 }
 0x82b   :  { %v1866_v40 = vsel %vm525_vm1, %v1861_v30, %v1865_v27 }
 0x82c   :  { %v1868_v13 = vmax.f32 %v1849_v41, %v1866_v40 }
 0x82e   :  { %1870 = vst [vmem:[#allocation1] ss:$2 sm:$0xff] %v1868_v13 }
 0x835   :  { %v1871_v37 = vld.sshfl [vmem:[#allocation1] sm:$0xff pattern:$0x75316420]  ;;  %v1872_v19 = vld.sshfl [vmem:[#allocation1 + $0x8] sm:$0xff pattern:$0x75316420] }
 0x836   :  { %v1875_v38 = vpack.c.bf16 %v1871_v37, %v1871_v37  ;;  %v1876_v54 = vpack.c.bf16 %v1872_v19, %v1872_v19 }
 0x838   :  { %2017 = vmatmul.bf16.vlgmr.msra.gmra.mxu2 %v1875_v38  ;;  %2030 = vmatmul.bf16.vlgmr.msrb.gmra.mxu3 %v1876_v54 }
 0x8bb   :  { %v2018_v22 = vpop.f32.mrf.mxu2  ;;  %v2031_v15 = vpop.f32.mrf.mxu3 }
 0x8bc   :  { %v2019_v58 = vadd.f32 %v2790_v53, %v2018_v22 }
 0x8be   :  { %v2032_v61 = vadd.f32 %v2031_v15, %v2019_v58 }
 0x8c0   :  { %v2035_v46 = vpack.c.bf16 %v2032_v61, %v2032_v61 }
 0x8c2   :  { %2112 = vmatmul.bf16.vlgmr.msrb.gmra.mxu2 %v2035_v46 }
 0x8c3   :  { %v2020_v62 = vpop.f32.mrf.mxu2  ;;  %v2033_v55 = vpop.f32.mrf.mxu3 }
 0x945   :  { %v2113_v60 = vpop.f32.mrf.mxu2 }
 0x946   :  { %v2114_v2 = vadd.f32 %v2791_v44, %v2113_v60 }
 0x948   :  { %2118 = vst.msk [vmem:[#allocation13] sm:$0xf] %vm2117_vm15, %v2114_v2 }
 0x949   :  { %2129 = dma.vmem_to_hbm [thread:$0]  %s2125_s30, 64, %s2127_s0, [#allocation7]  }
 0x94d   :  { %v2115_v47 = vpop.f32.mrf.mxu2 }
 0x94e   :  { %3001 = dma.done.wait [#allocation7], 64  }
 0x94f   :  { %3002 = vsyncadd [#allocation7], 4294967232 }
 0x950   :  { %2134 = vsyncpa [#allocation6], 1 }
 0x951   :  { %2135 = vsyncpa [#allocation9], 1 }
 0x952   :  { %2136 = vsyncpa [#allocation12], 1 }
 0x953   :  { %2137 = vsyncpa [#allocation7], 1 }

</bundles_post_ra>
